<compile_context>
chip_gen: v7x
topology: tpu7x:2x2x1
jax: 0.10.0
libtpu: 0.0.40
codegen_flags: <defaults>
</compile_context>

<pallas_src>
import functools
import math

import jax
import jax.numpy as jnp
from jax import lax
from jax.experimental import pallas as pl
from jax.experimental.pallas import tpu as pltpu


_MIN_TOTAL_BYTES = 256 * 1024   # below this, XLA's fused reduce wins
_MIN_LANES = 128                # W below this wastes most of every vreg


def _round_down(x, m):
    return (x // m) * m


def _vmem_budget():
    """(per-input-tile bytes, vmem_limit_bytes) chosen per TPU generation."""
    try:
        info = pltpu.get_tpu_info()
        vmem_cap = int(getattr(info, "vmem_capacity_bytes", 64 * 1024 * 1024))
    except Exception:
        vmem_cap = 64 * 1024 * 1024  # conservative (v7x per-TC VMEM)
    if vmem_cap >= 128 * 1024 * 1024:
        # v5e / v6e: 128 MiB physical. 2 x 16 MiB double-buffered input + small
        # outputs/scratch fits comfortably under a 64 MiB scoped limit.
        return 16 * 1024 * 1024, 64 * 1024 * 1024
    # v7x: 64 MiB physical per TC -> smaller tiles, 32 MiB scoped limit.
    return 8 * 1024 * 1024, 32 * 1024 * 1024


def _pick_tiles(R, W, dsize, pack, tile_bytes):
    """Choose (tm rows, tw cols) per input tile."""
    row_bytes = W * dsize
    if row_bytes * pack <= tile_bytes:
        # Common path: whole rows per tile (tw == W, single reduction chunk).
        tw = W
        max_rows = min(max(1, tile_bytes // row_bytes), R)
        # Keep enough grid steps for DMA pipelining and megacore sharding:
        # >= 8 steps when tiles can stay >= 128 rows, else >= 2 steps (v7x 2 TCs).
        if R // 8 >= 128:
            max_rows = min(max_rows, pl.cdiv(R, 8))
        elif R // 2 >= pack:
            max_rows = min(max_rows, pl.cdiv(R, 2))
        if R <= pack:
            tm = R                               # full-dim block (always legal)
        elif max_rows >= 128:
            tm = _round_down(max_rows, 128)      # lane-dense, unmasked output store
        else:
            tm = max(pack, _round_down(max_rows, pack))
        tm = min(tm, R)
    else:
        # Very wide rows: split the reduction axis into lane-aligned chunks and
        # accumulate across them (accumulator is tiny: tm x f32).
        tm = R if R <= pack else min(64, _round_down(R, pack))
        tw = max(128, _round_down(tile_bytes // (tm * dsize), 128))
        tw = min(tw, _round_down(W, 128))
    return tm, tw


def _row_sum_kernel(x_ref, o_ref, acc_ref, *, acc_dtype, tw, w_total, wc):
    """Grid (g, wc); x_ref: (tm, tw); o_ref/acc_ref: (1, 1, tm) lane-dense."""
    j = pl.program_id(1)

    @pl.when(j == 0)
    def _():
        acc_ref[...] = jnp.zeros_like(acc_ref)

    x = x_ref[...]
    if w_total % tw != 0:
        # Ragged last W-chunk: out-of-bounds lanes hold garbage -> mask them.
        col = lax.broadcasted_iota(jnp.int32, x.shape, dimension=1)
        x = jnp.where(j * tw + col < w_total, x, jnp.zeros_like(x))
    acc_ref[...] += jnp.sum(x, axis=-1, dtype=acc_dtype)[None, None, :]

    @pl.when(j == wc - 1)
    def _():
        o_ref[...] = acc_ref[...].astype(o_ref.dtype)


def sum3d2d(x, dim=-1, *, tile_bytes=None):
    """Equivalent of torch `x.sum(dim=dim, keepdim=True)`."""
    ndim = x.ndim
    if ndim == 0:
        return jnp.sum(x, keepdims=True)
    axis = dim % ndim

    # Pallas fast path targets a last-dim reduction on >=2-D inputs.
    if ndim < 2 or axis != ndim - 1:
        return jnp.sum(x, axis=axis, keepdims=True)

    orig_shape = x.shape
    W = orig_shape[-1]
    R = math.prod(orig_shape[:-1])
    dsize = jnp.dtype(x.dtype).itemsize
    total_bytes = R * W * dsize

    # Tiny problems: per-grid-step overhead and masked lanes dominate -> use XLA.
    if W < _MIN_LANES or R < 8 or total_bytes < _MIN_TOTAL_BYTES:
        return jnp.sum(x, axis=-1, keepdims=True)

    if jnp.issubdtype(x.dtype, jnp.floating):
        acc_dtype = jnp.float32
        out_dtype = x.dtype
    elif jnp.issubdtype(x.dtype, jnp.integer):
        # TODO(synk): torch promotes integer sums to int64; without jax x64 we
        # accumulate and emit int32 (matches jnp.sum's default-int behavior).
        acc_dtype = jnp.int32
        out_dtype = jnp.promote_types(x.dtype, jnp.int32)
    else:
        acc_dtype = x.dtype
        out_dtype = x.dtype

    pack = max(8, 32 // dsize)                # sublane packing: f32->8, bf16->16, i8->32
    budget, vmem_limit = _vmem_budget()
    if tile_bytes is not None:                # test/override hook
        budget = tile_bytes

    tm, tw = _pick_tiles(R, W, dsize, pack, budget)
    g = pl.cdiv(R, tm)
    wc = pl.cdiv(W, tw)

    # Free metadata reshape for contiguous input: (..., W) -> (R, W).
    x2 = x.reshape(R, W)

    kernel = functools.partial(
        _row_sum_kernel, acc_dtype=acc_dtype, tw=tw, w_total=W, wc=wc)

    out = pl.pallas_call(
        kernel,
        out_shape=jax.ShapeDtypeStruct((g, 1, tm), out_dtype),
        grid=(g, wc),
        in_specs=[pl.BlockSpec((tm, tw), lambda i, j: (i, j))],
        out_specs=pl.BlockSpec((1, 1, tm), lambda i, j: (i, 0, 0)),
        scratch_shapes=[pltpu.VMEM((1, 1, tm), acc_dtype)],
        compiler_params=pltpu.CompilerParams(
            dimension_semantics=("parallel", "arbitrary"),
            vmem_limit_bytes=vmem_limit,
        ),
        cost_estimate=pl.CostEstimate(
            flops=R * W,
            transcendentals=0,
            bytes_accessed=total_bytes + R * jnp.dtype(out_dtype).itemsize,
        ),
    )(x2)

    # (g, 1, tm) -> (g*tm,) -> drop the padded tail rows -> (..., 1).
    flat = out.reshape(g * tm)[:R]
    return flat.reshape(*orig_shape[:-1], 1)


if __name__ == "__main__":
    key = jax.random.PRNGKey(0)
    k1, k2, k3, k4 = jax.random.split(key, 4)

    # 1) Module-spec small shape (B, C, H, W) = (2, 4, 16, 16).
    #    (W=16 < 128 -> routed through the jnp fallback by design.)
    x_small = jax.random.normal(k1, (2, 4, 16, 16), dtype=jnp.float32)
    out_small = jax.block_until_ready(sum3d2d(x_small, dim=-1))
    ref_small = jnp.sum(x_small, axis=-1, keepdims=True)
    assert out_small.shape == (2, 4, 16, 1), out_small.shape
    assert jnp.allclose(out_small, ref_small, atol=1e-5, rtol=1e-5)

    # 2) Pallas row path, even division (R=512, W=256, f32).
    x_big = jax.random.normal(k2, (2, 4, 64, 256), dtype=jnp.float32)
    out_big = jax.block_until_ready(sum3d2d(x_big, dim=-1))
    ref_big = jnp.sum(x_big, axis=-1, keepdims=True)
    assert out_big.shape == (2, 4, 64, 1), out_big.shape
    assert jnp.allclose(out_big, ref_big, atol=1e-4, rtol=1e-4)

    # 3) Pallas row path with ragged last row-block (R=420 not a multiple of tm).
    x_ragged = jax.random.normal(k3, (5, 7, 12, 384), dtype=jnp.float32)
    out_ragged = jax.block_until_ready(sum3d2d(x_ragged, dim=-1))
    ref_ragged = jnp.sum(x_ragged, axis=-1, keepdims=True)
    assert out_ragged.shape == (5, 7, 12, 1), out_ragged.shape
    assert jnp.allclose(out_ragged, ref_ragged, atol=1e-3, rtol=1e-5)

    # 4) bf16 input -> f32 accumulation inside the kernel.
    x_bf16 = x_big.astype(jnp.bfloat16)
    out_bf16 = jax.block_until_ready(sum3d2d(x_bf16, dim=-1))
    ref_bf16 = jnp.sum(x_bf16.astype(jnp.float32), axis=-1, keepdims=True)
    assert out_bf16.shape == (2, 4, 64, 1), out_bf16.shape
    assert jnp.allclose(out_bf16.astype(jnp.float32), ref_bf16, atol=0.5, rtol=0.02)

    # 5) Force the W-split (accumulator) path + ragged W-chunk with a tiny tile
    #    budget override: (R=16, W=8000) -> tm=16, tw=1024, wc=8, masked tail.
    x_wide = jax.random.normal(k4, (16, 8000), dtype=jnp.float32)
    out_wide = jax.block_until_ready(sum3d2d(x_wide, dim=-1, tile_bytes=64 * 1024))
    ref_wide = jnp.sum(x_wide, axis=-1, keepdims=True)
    assert out_wide.shape == (16, 1), out_wide.shape
    assert jnp.allclose(out_wide, ref_wide, atol=2e-3, rtol=1e-5)

    print("KERNEL_OK")
</pallas_src>

<mosaic_0001>
module attributes {stable_mosaic.version = 11 : i64} {
  func.func @_row_sum_kernel(%arg0: i32, %arg1: i32, %arg2: memref<256x256xf32, #tpu.memory_space<vmem>>, %arg3: memref<1x1x256xf32, #tpu.memory_space<vmem>>, %arg4: memref<1x1x256xf32, #tpu.memory_space<vmem>>) attributes {dimension_semantics = [#tpu.dimension_semantics<parallel>, #tpu.dimension_semantics<arbitrary>], iteration_bounds = array<i64: 2, 1>, scalar_prefetch = 0 : i64, scratch_operands = 1 : i64, tpu.core_type = #tpu.core_type<tc>, window_params = [{transform_indices = @transform_0, window_bounds = array<i64: 256, 256>}, {transform_indices = @transform_1, window_bounds = array<i64: 1, 1, 256>}]} {
    %c0_i32 = arith.constant 0 : i32
    %0 = arith.cmpi eq, %arg1, %c0_i32 : i32
    %1 = arith.extui %0 : i1 to i32
    %c0_i32_0 = arith.constant 0 : i32
    %2 = arith.cmpi ne, %1, %c0_i32_0 : i32
    scf.if %2 {
      %cst_10 = arith.constant 0.000000e+00 : f32
      %12 = vector.broadcast %cst_10 : f32 to vector<1x1x256xf32>
      %c0_11 = arith.constant 0 : index
      %c0_12 = arith.constant 0 : index
      %c0_13 = arith.constant 0 : index
      %13 = vector.load %arg4[%c0_11, %c0_12, %c0_13] : memref<1x1x256xf32, #tpu.memory_space<vmem>>, vector<1x1x256xf32>
      tpu.vector_store %arg4[%c0_11, %c0_12, %c0_13], %12 {strides = array<i32>} : memref<1x1x256xf32, #tpu.memory_space<vmem>>, vector<1x1x256xf32>,
    } else {
    }
    %c0 = arith.constant 0 : index
    %c0_1 = arith.constant 0 : index
    %3 = vector.load %arg2[%c0, %c0_1] : memref<256x256xf32, #tpu.memory_space<vmem>>, vector<256x256xf32>
    %c0_2 = arith.constant 0 : index
    %c0_3 = arith.constant 0 : index
    %c0_4 = arith.constant 0 : index
    %4 = vector.load %arg4[%c0_2, %c0_3, %c0_4] : memref<1x1x256xf32, #tpu.memory_space<vmem>>, vector<1x1x256xf32>
    %cst = arith.constant dense<0.000000e+00> : vector<256xf32>
    %5 = vector.multi_reduction <add>, %3, %cst [1] : vector<256x256xf32> to vector<256xf32>
    %6 = vector.shape_cast %5 : vector<256xf32> to vector<1x1x256xf32>
    %7 = arith.addf %4, %6 : vector<1x1x256xf32>
    %c0_5 = arith.constant 0 : index
    %c0_6 = arith.constant 0 : index
    %c0_7 = arith.constant 0 : index
    %8 = vector.load %arg4[%c0_5, %c0_6, %c0_7] : memref<1x1x256xf32, #tpu.memory_space<vmem>>, vector<1x1x256xf32>
    tpu.vector_store %arg4[%c0_5, %c0_6, %c0_7], %7 {strides = array<i32>} : memref<1x1x256xf32, #tpu.memory_space<vmem>>, vector<1x1x256xf32>,
    %c0_i32_8 = arith.constant 0 : i32
    %9 = arith.cmpi eq, %arg1, %c0_i32_8 : i32
    %10 = arith.extui %9 : i1 to i32
    %c0_i32_9 = arith.constant 0 : i32
    %11 = arith.cmpi ne, %10, %c0_i32_9 : i32
    scf.if %11 {
      %c0_10 = arith.constant 0 : index
      %c0_11 = arith.constant 0 : index
      %c0_12 = arith.constant 0 : index
      %12 = vector.load %arg4[%c0_10, %c0_11, %c0_12] : memref<1x1x256xf32, #tpu.memory_space<vmem>>, vector<1x1x256xf32>
      %c0_13 = arith.constant 0 : index
      %c0_14 = arith.constant 0 : index
      %c0_15 = arith.constant 0 : index
      %13 = vector.load %arg3[%c0_13, %c0_14, %c0_15] : memref<1x1x256xf32, #tpu.memory_space<vmem>>, vector<1x1x256xf32>
      tpu.vector_store %arg3[%c0_13, %c0_14, %c0_15], %12 {strides = array<i32>} : memref<1x1x256xf32, #tpu.memory_space<vmem>>, vector<1x1x256xf32>,
    } else {
    }
    return
  }
  func.func @transform_0(%arg0: i32, %arg1: i32) -> (i32, i32) {
    %c0_i32 = arith.constant 0 : i32
    return %arg0, %arg1 : i32, i32
  }
  func.func @transform_1(%arg0: i32, %arg1: i32) -> (i32, i32, i32) {
    %c0_i32 = arith.constant 0 : i32
    %c0_i32_0 = arith.constant 0 : i32
    %c0_i32_1 = arith.constant 0 : i32
    return %arg0, %c0_i32, %c0_i32_0 : i32, i32, i32
  }
}

</mosaic_0001>

<bundles_post_ra>
// kernel: tpu_custom_call.1
= control target key start
LH: loop header
LB: loop body
LE: loop exit
PB: predicated region body
PF: predicated region fallthrough
CT: control target
= control target key end

     0   :  { %6 = vsyncpa [#allocation4], 0  ;;  %s4507_s0 = inlined_call_operand.hbm [shape: f32[512,256], index: 0, kind: input, shape index: {}]   ;;  %s4508_s1 = inlined_call_operand.hbm [shape: f32[2,1,256], index: 1, kind: output, shape index: {}]  }
   0x1   :  { %8 = vsyncpa [#allocation4 + $0x1], 0 }
   0x2   :  { %9 = vsyncpa [#allocation5], 0 }
   0x3   :  { %11 = vsyncpa [#allocation5 + $0x1], 0  ;;  %s3576_s6 = smov 0   ;;  %s3578_s7 = smov 0  }
   0x4   :  { %s3580_s8 = smov 0   ;;  %s3582_s9 = smov 0  }
   0x5   :  { %s3584_s10 = smov 0   ;;  %s3586_s11 = smov 0  }
   0x6 LB: > { %s3357_s12 = sadd.s32 4294967295, %s3557_s11   ;;  %s3358_s13 = sadd.s32 4294967294, %s3557_s11   ;;  %s3557_s11 = sphi %s3586_s11, %s17_s11   ;;  %s3553_s10 = sphi %s3584_s10, %s4525_s10   ;;  %s3549_s9 = sphi %s3582_s9, %s4524_s9   ;;  %s3545_s8 = sphi %s3580_s8, %s4523_s8   ;;  %s3541_s7 = sphi %s3578_s7, %s4522_s7   ;;  %s3537_s6 = sphi %s3576_s6, %s4521_s6  }
   0x7   : > { %s29_s14 = sadd.s32 1, %s3553_s10  ;;  %s38_s15 = sadd.s32 1, %s3545_s8 }
   0x8   : > { %p31_p0 = scmp.ge.s32.totalorder %s29_s14, 2  ;;  %p45_p1 = scmp.ne.s32.totalorder %s3545_s8, %s3541_s7 }
   0x9   : > { %p46_p2 = scmp.eq.s32.totalorder %s3557_s11, 0  ;;  %p51_p3 = scmp.ne.s32.totalorder %s3541_s7, %s3537_s6 }
   0xa   : > { %s4527_s14 = smov (%p31_p0, %s29_s14), 0  ;;  %p52_p5 = scmp.eq.s32.totalorder %s3357_s12, 0 }
   0xb   : > { %p3617_p4 = por %p46_p2, %p45_p1  ;;  %s33_s17 = ssub.s32 %s3553_s10, %s4527_s14 }
   0xc   : > { %p75_p6 = scmp.eq.s32.totalorder %s3357_s12, 1  ;;  %p36_p7 = scmp.eq.s32.totalorder %s33_s17, 0 }
   0xd   : > { %p3623_p8 = por %p52_p5, %p51_p3  ;;  %p81_p10 = scmp.eq.s32.totalorder %s3358_s13, 1 }
   0xe   : > { %p3627_p9 = por %p75_p6, %p45_p1  ;;  %p3388_p13 = scmp.lt.s32.totalorder %s3557_s11, 2 }
   0xf   : > { %s3632_s20 = scalar_select %p36_p7, %s3545_s8, %s38_s15  }
  0x10   : > { %s4512_s19 = scalar_select %p3627_p9, 1, 0 }
  0x11   : > { %p3634_p11 = por %p81_p10, %p51_p3  ;;  %s101_s22 = sand.u32 1, %s3545_s8  }
  0x12   : > { %s3361_s23 = sshll.u32 %s101_s22, 9  ;;  %s3374_s24 = sshll.u32 %s3553_s10, 13 }
  0x13   : > { %s4513_s21 = scalar_select %p3634_p11, 1, 0 }
  0x14   : > { %s3645_s27 = scalar_lea.hbm %s4507_s0, %s3374_s24  ;;  %s105_s28 = scalar_lea.vmem [#allocation3], %s3361_s23 }
  0x15   : > { %s115_s29 = sshll.u32 %s105_s28, 4  ;;  %p3651_p0 = pnand %p3388_p13, %p3617_p4  ;;  %s3647_s29 = int_to_ptr.vmem [resolvable:$true] %s115_s29 }
  0x16   : > { %s3656_s2 = scalar_lea.sflag [#allocation4], %s101_s22  ;;  %s3445_s3 = scalar_lea.hbm %s3645_s27, 8192 }
  0x17   : > { %p3446_p2 = scmp.ne.s32.totalorder %s3645_s27, %s3445_s3  ;;  %p3447_p3 = pneg %p3651_p0 }
  0x18   : > { %s3450_s12 = scalar_lea.hbm %s4507_s0, 16384  ;;  %p3451_p4 = scmp.lt.u32.totalorder %s3645_s27, %s4507_s0 }
  0x19   : > { %p3448_p5 = pnand %p3447_p3, %p3446_p2  ;;  %p3452_p7 = scmp.lt.u32.totalorder %s3450_s12, %s3445_s3 }
  0x1a   : > { %p3454_p13 = scmp.lt.u32.totalorder %s3445_s3, %s3645_s27 }
  0x1b   : > { %p3449_p6 = pneg %p3448_p5  ;;  %p3453_p10 = por %p3452_p7, %p3451_p4 }
  0x1d   : > { %p3455_p12 = por %p3454_p13, %p3453_p10 }
  0x1f   : > { %p3456_p1 = pnand %p3455_p12, %p3449_p6 }
  0x21   : > { %3459 = shalt.err (!%p3456_p1)
}
  0x22   : > { %s3460_s16 = scalar_lea.vmem %s3647_s29, 8192  ;;  %s3559_s17 = smov [#allocation3]  }
  0x23   : > { %p3461_p2 = scmp.ne.s32.totalorder %s3647_s29, %s3460_s16  ;;  %s3465_s22 = sshll.u32 %s3559_s17, 4  ;;  %s3466_s22 = int_to_ptr.vmem [resolvable:$false] %s3465_s22 }
  0x24   : > { %s3467_s23 = scalar_lea.vmem %s3466_s22, 16384  ;;  %p3468_p9 = scmp.lt.s32.totalorder %s3647_s29, %s3466_s22 }
  0x25   : > { %p3463_p5 = pnand %p3461_p2, %p3447_p3  ;;  %p3469_p4 = scmp.lt.s32.totalorder %s3467_s23, %s3460_s16 }
  0x27   : > { %p3464_p11 = pneg %p3463_p5  ;;  %p3470_p7 = por %p3469_p4, %p3468_p9 }
  0x29   : > { %p3471_p10 = pnand %p3470_p7, %p3464_p11 }
  0x2b   : > { %3474 = shalt.err (!%p3471_p10)
}
  0x2c   : > { %s3560_s24 = smov 256   ;;  %s3561_s25 = smov 16  }
  0x2d   : > { %3383 = dma.hbm_to_vmem [thread:$0]  (!%p3651_p0), %s3645_s27, 8192, %s3647_s29, %s3656_s2, %s3560_s24, %s3560_s24, %s3561_s25  }
  0x2e   : > { %p123_p12 = scmp.lt.s32.totalorder %s3557_s11, 3  ;;  %p4515_p1 = scmp.ge.s32.totalorder %s3557_s11, 1 }
  0x30   : > { %p124_p3 = pnand %p4515_p1, %p123_p12 }
  0x31   : > { %s3688_s26 = sand.u32 (!%p124_p3), 1, %s3541_s7  }
  0x32   : > { %127 = sbr.rel (%p124_p3) target bundleno = 539 (0x21b), region = 24  ;;  %s3366_s28 = sshll.u32 (!%p124_p3), %s3688_s26, 9 }
  0x33   : > { %s130_s3 = scalar_lea.sflag (!%p124_p3), [#allocation4], %s3688_s26  ;;  %s3692_s4 = scalar_lea.vmem (!%p124_p3), [#allocation3], %s3366_s28 }
  0x39   : > { %3528 = dma.done.wait (%p3623_p8), %s130_s3, 8192  }
  0x3a   : > { %3530 = vsyncadd (%p3623_p8), %s130_s3, 4294959104  ;;  %v167_v0 = vld [vmem:[%s3692_s4 + $0x20] sm:$0xff]  ;;  %v168_v1 = vld [vmem:[%s3692_s4 + $0x28] sm:$0xff]  ;;  %v3562_v46 = vmov 0   ;;  %vm3055_vm1 = vcmask 130112   ;;  %vm3062_vm2 = vcmask 195712  }
  0x3b   : > { %v163_v2 = vld [vmem:[%s3692_s4] sm:$0xff]  ;;  %v234_v3 = vadd.f32 %v168_v1, %v167_v0  ;;  %v164_v4 = vld [vmem:[%s3692_s4 + $0x8] sm:$0xff]  ;;  %v169_v5 = vld [vmem:[%s3692_s4 + $0x30] sm:$0xff]  ;;  %3443 = vset.pattern.permute.xlu0 %v3562_v46  ;;  %3444 = vset.pattern.permute.xlu1 %v3562_v46  ;;  %vm3069_vm3 = vcmask 261312   ;;  %vm3076_vm4 = vcmask 326912   ;;  %vm3083_vm5 = vcmask 392512  }
  0x3c   : > { %v170_v6 = vld [vmem:[%s3692_s4 + $0x38] sm:$0xff]  ;;  %v228_v7 = vadd.f32 %v164_v4, %v163_v2  ;;  %v165_v8 = vld [vmem:[%s3692_s4 + $0x10] sm:$0xff]  ;;  %v171_v14 = vld [vmem:[%s3692_s4 + $0x40] sm:$0xff]  ;;  %vm3090_vm6 = vcmask 458112   ;;  %vm3097_vm7 = vcmask 523712   ;;  %vm3104_vm8 = vcmask 589312  }
  0x3d   : > { %v166_v9 = vld [vmem:[%s3692_s4 + $0x18] sm:$0xff]  ;;  %235 = vadd.xlane.f32.xlu1 %v234_v3  ;;  %v237_v10 = vadd.f32 %v170_v6, %v169_v5  ;;  %v173_v12 = vld [vmem:[%s3692_s4 + $0x50] sm:$0xff]  ;;  %v172_v15 = vld [vmem:[%s3692_s4 + $0x48] sm:$0xff]  ;;  %vm3111_vm9 = vcmask 654912   ;;  %vm3118_vm10 = vcmask 720512   ;;  %vm3125_vm11 = vcmask 786112  }
  0x3e   : > { %229 = vadd.xlane.f32.xlu0 %v228_v7  ;;  %v231_v11 = vadd.f32 %v166_v9, %v165_v8  ;;  %v174_v13 = vld [vmem:[%s3692_s4 + $0x58] sm:$0xff]  ;;  %v240_v17 = vadd.f32 %v172_v15, %v171_v14  ;;  %v177_v18 = vld [vmem:[%s3692_s4 + $0x70] sm:$0xff]  ;;  %v175_v20 = vld [vmem:[%s3692_s4 + $0x60] sm:$0xff]  ;;  %vm3132_vm12 = vcmask 851712   ;;  %vm3139_vm13 = vcmask 917312   ;;  %s3367_s18 = sshll.u32 %s3688_s26, 1 }
  0x3f   : > { %v243_v16 = vadd.f32 %v174_v13, %v173_v12  ;;  %v178_v19 = vld [vmem:[%s3692_s4 + $0x78] sm:$0xff]  ;;  %v176_v21 = vld [vmem:[%s3692_s4 + $0x68] sm:$0xff]  ;;  %v181_v24 = vld [vmem:[%s3692_s4 + $0x90] sm:$0xff]  ;;  %vm3146_vm14 = vcmask 982912   ;;  %vm3153_vm15 = vcmask 1048512   ;;  %s3375_s27 = sshll.u32 %s3549_s9, 5 }
  0x40   : > { %v249_v22 = vadd.f32 %v178_v19, %v177_v18  ;;  %v246_v23 = vadd.f32 %v176_v21, %v175_v20  ;;  %v182_v25 = vld [vmem:[%s3692_s4 + $0x98] sm:$0xff]  ;;  %v179_v26 = vld [vmem:[%s3692_s4 + $0x80] sm:$0xff]  ;;  %v180_v27 = vld [vmem:[%s3692_s4 + $0x88] sm:$0xff]  ;;  %s151_s29 = scalar_lea.vmem [#allocation6], %s3367_s18  ;;  %s4456_s12 = scalar_lea.hbm %s4508_s1, %s3375_s27 }
  0x41   : > { %238 = vadd.xlane.f32.xlu1 %v237_v10  ;;  %v255_v28 = vadd.f32 %v182_v25, %v181_v24  ;;  %v252_v29 = vadd.f32 %v180_v27, %v179_v26  ;;  %v185_v30 = vld [vmem:[%s3692_s4 + $0xb0] sm:$0xff]  ;;  %v186_v31 = vld [vmem:[%s3692_s4 + $0xb8] sm:$0xff]  ;;  %v183_v32 = vld [vmem:[%s3692_s4 + $0xa0] sm:$0xff]  ;;  %s3276_s30 = sshll.u32 %s151_s29, 4  ;;  %s3262_s13 = scalar_lea.sflag [#allocation5], %s3688_s26  ;;  %s4458_s30 = int_to_ptr.vmem [resolvable:$true] %s3276_s30 }
  0x42   : > { %232 = vadd.xlane.f32.xlu0 %v231_v11  ;;  %v184_v33 = vld [vmem:[%s3692_s4 + $0xa8] sm:$0xff]  ;;  %v261_v34 = vadd.f32 %v186_v31, %v185_v30  ;;  %v189_v36 = vld [vmem:[%s3692_s4 + $0xd0] sm:$0xff]  ;;  %v190_v37 = vld [vmem:[%s3692_s4 + $0xd8] sm:$0xff]  ;;  %s3475_s15 = scalar_lea.vmem %s4458_s30, 32  ;;  %p4518_p9 = scmp.ne.s32.totalorder %s4512_s19, 0 }
  0x43   : > { %v258_v35 = vadd.f32 %v184_v33, %v183_v32  ;;  %v187_v38 = vld [vmem:[%s3692_s4 + $0xc0] sm:$0xff]  ;;  %v188_v39 = vld [vmem:[%s3692_s4 + $0xc8] sm:$0xff]  ;;  %v267_v40 = vadd.f32 %v190_v37, %v189_v36  ;;  %v197_v42 = vld [vmem:[%s3692_s4 + $0x110] sm:$0xff]  ;;  %v158_v33 = vlaneseq  ;;  %p3476_p8 = scmp.ne.s32.totalorder %s4458_s30, %s3475_s15  ;;  %s3565_s9 = smov [#allocation6]  }
  0x44   : > { %v264_v41 = vadd.f32 %v188_v39, %v187_v38  ;;  %v198_v43 = vld [vmem:[%s3692_s4 + $0x118] sm:$0xff]  ;;  %v195_v44 = vld [vmem:[%s3692_s4 + $0x100] sm:$0xff]  ;;  %v196_v45 = vld [vmem:[%s3692_s4 + $0x108] sm:$0xff]  ;;  %s3479_s16 = sshll.u32 %s3565_s9, 4  ;;  %s3480_s16 = int_to_ptr.vmem [resolvable:$false] %s3479_s16 }
  0x45   : > { %244 = vadd.xlane.f32.xlu1 %v243_v16  ;;  %v279_v47 = vadd.f32 %v198_v43, %v197_v42  ;;  %v276_v48 = vadd.f32 %v196_v45, %v195_v44  ;;  %v201_v49 = vld [vmem:[%s3692_s4 + $0x130] sm:$0xff]  ;;  %v202_v50 = vld [vmem:[%s3692_s4 + $0x138] sm:$0xff]  ;;  %v199_v51 = vld [vmem:[%s3692_s4 + $0x120] sm:$0xff]  ;;  %v3763_v36 = vshrl.u32 %v158_v33, 7  ;;  %vm4331_vm0 = vcmp.lt.s32.totalorder %v158_v33, 256  ;;  %p3477_p11 = pnand %p3476_p8, %p4518_p9  ;;  %s3481_s17 = scalar_lea.vmem %s3480_s16, 64 }
  0x46   : > { %241 = vadd.xlane.f32.xlu0 %v240_v17  ;;  %v200_v52 = vld [vmem:[%s3692_s4 + $0x128] sm:$0xff]  ;;  %v285_v53 = vadd.f32 %v202_v50, %v201_v49  ;;  %v205_v55 = vld [vmem:[%s3692_s4 + $0x150] sm:$0xff]  ;;  %v206_v56 = vld [vmem:[%s3692_s4 + $0x158] sm:$0xff]  ;;  %p3482_p6 = scmp.lt.s32.totalorder %s4458_s30, %s3480_s16  ;;  %p3483_p13 = scmp.lt.s32.totalorder %s3481_s17, %s3475_s15 }
  0x47   : > { %v282_v54 = vadd.f32 %v200_v52, %v199_v51  ;;  %v203_v57 = vld [vmem:[%s3692_s4 + $0x140] sm:$0xff]  ;;  %v204_v58 = vld [vmem:[%s3692_s4 + $0x148] sm:$0xff]  ;;  %v291_v59 = vadd.f32 %v206_v56, %v205_v55  ;;  %v209_v61 = vld [vmem:[%s3692_s4 + $0x170] sm:$0xff]  ;;  %v3766_v38 = vsub.s32 0, %v3763_v36  ;;  %v3769_v39 = vsub.s32 1, %v3763_v36  ;;  %p3478_p0 = pneg %p3477_p11 }
  0x48   : > { %v288_v60 = vadd.f32 %v204_v58, %v203_v57  ;;  %v210_v62 = vld [vmem:[%s3692_s4 + $0x178] sm:$0xff]  ;;  %v207_v63 = vld [vmem:[%s3692_s4 + $0x160] sm:$0xff]  ;;  %v208_v0 = vld [vmem:[%s3692_s4 + $0x168] sm:$0xff]  ;;  %v3778_v42 = vsub.s32 4, %v3763_v36  ;;  %v3781_v43 = vsub.s32 5, %v3763_v36  ;;  %v3784_v44 = vsub.s32 6, %v3763_v36  ;;  %p3484_p2 = por %p3483_p13, %p3482_p6 }
  0x49   : > { %250 = vadd.xlane.f32.xlu1 %v249_v22  ;;  %v297_v1 = vadd.f32 %v210_v62, %v209_v61  ;;  %v294_v2 = vadd.f32 %v208_v0, %v207_v63  ;;  %v213_v3 = vld [vmem:[%s3692_s4 + $0x190] sm:$0xff]  ;;  %v214_v4 = vld [vmem:[%s3692_s4 + $0x198] sm:$0xff]  ;;  %v211_v5 = vld [vmem:[%s3692_s4 + $0x180] sm:$0xff]  ;;  %v3787_v45 = vsub.s32 7, %v3763_v36 }
  0x4a   : > { %247 = vadd.xlane.f32.xlu0 %v246_v23  ;;  %v212_v6 = vld [vmem:[%s3692_s4 + $0x188] sm:$0xff]  ;;  %v303_v7 = vadd.f32 %v214_v4, %v213_v3  ;;  %v217_v9 = vld [vmem:[%s3692_s4 + $0x1b0] sm:$0xff]  ;;  %v218_v10 = vld [vmem:[%s3692_s4 + $0x1b8] sm:$0xff]  ;;  %p3485_p5 = pnand %p3484_p2, %p3478_p0 }
  0x4b   : > { %v300_v8 = vadd.f32 %v212_v6, %v211_v5  ;;  %v215_v11 = vld [vmem:[%s3692_s4 + $0x1a0] sm:$0xff]  ;;  %v216_v12 = vld [vmem:[%s3692_s4 + $0x1a8] sm:$0xff]  ;;  %v309_v13 = vadd.f32 %v218_v10, %v217_v9  ;;  %v221_v15 = vld [vmem:[%s3692_s4 + $0x1d0] sm:$0xff] }
  0x4c   : > { %v306_v14 = vadd.f32 %v216_v12, %v215_v11  ;;  %v222_v16 = vld [vmem:[%s3692_s4 + $0x1d8] sm:$0xff]  ;;  %v219_v17 = vld [vmem:[%s3692_s4 + $0x1c0] sm:$0xff]  ;;  %v220_v18 = vld [vmem:[%s3692_s4 + $0x1c8] sm:$0xff] }
  0x4d   : > { %256 = vadd.xlane.f32.xlu1 %v255_v28  ;;  %v315_v19 = vadd.f32 %v222_v16, %v221_v15  ;;  %v312_v20 = vadd.f32 %v220_v18, %v219_v17  ;;  %v223_v21 = vld [vmem:[%s3692_s4 + $0x1e0] sm:$0xff]  ;;  %v224_v22 = vld [vmem:[%s3692_s4 + $0x1e8] sm:$0xff]  ;;  %v225_v26 = vld [vmem:[%s3692_s4 + $0x1f0] sm:$0xff] }
  0x4e   : > { %253 = vadd.xlane.f32.xlu0 %v252_v29  ;;  %v191_v23 = vld [vmem:[%s3692_s4 + $0xe0] sm:$0xff]  ;;  %v192_v24 = vld [vmem:[%s3692_s4 + $0xe8] sm:$0xff]  ;;  %v318_v25 = vadd.f32 %v224_v22, %v223_v21  ;;  %v226_v27 = vld [vmem:[%s3692_s4 + $0x1f8] sm:$0xff] }
  0x4f   : > { %v270_v28 = vadd.f32 %v192_v24, %v191_v23  ;;  %v193_v29 = vld [vmem:[%s3692_s4 + $0xf0] sm:$0xff]  ;;  %v194_v30 = vld [vmem:[%s3692_s4 + $0xf8] sm:$0xff]  ;;  %v321_v31 = vadd.f32 %v226_v27, %v225_v26 }
  0x50   : > { %v273_v32 = vadd.f32 %v194_v30, %v193_v29 }
  0x51   : > { %262 = vadd.xlane.f32.xlu1 %v261_v34  ;;  %v3563_v34 = vmov 1966171168  }
  0x52   : > { %259 = vadd.xlane.f32.xlu0 %v258_v35  ;;  %v1385_v35 = vunpack.c.l.s4 %v3563_v34 }
  0x54   : > { %v1386_v37 = vunpack.c.0.s8 %v1385_v35 }
  0x55   : > { %268 = vadd.xlane.f32.xlu1 %v267_v40  ;;  %v3772_v40 = vsub.s32 2, %v3763_v36 }
  0x56   : > { %265 = vadd.xlane.f32.xlu0 %v264_v41  ;;  %v3775_v41 = vsub.s32 3, %v3763_v36 }
  0x59   : > { %280 = vadd.xlane.f32.xlu1 %v279_v47  ;;  %v3790_v47 = vsub.s32 %v1386_v37, %v3763_v36 }
  0x5a   : > { %277 = vadd.xlane.f32.xlu0 %v276_v48 }
  0x5d   : > { %286 = vadd.xlane.f32.xlu1 %v285_v53 }
  0x5e   : > { %283 = vadd.xlane.f32.xlu0 %v282_v54 }
  0x61   : > { %292 = vadd.xlane.f32.xlu1 %v291_v59 }
  0x62   : > { %289 = vadd.xlane.f32.xlu0 %v288_v60 }
  0x65   : > { %298 = vadd.xlane.f32.xlu1 %v297_v1 }
  0x66   : > { %295 = vadd.xlane.f32.xlu0 %v294_v2 }
  0x69   : > { %304 = vadd.xlane.f32.xlu1 %v303_v7 }
  0x6a   : > { %301 = vadd.xlane.f32.xlu0 %v300_v8 }
  0x6d   : > { %310 = vadd.xlane.f32.xlu1 %v309_v13 }
  0x6e   : > { %307 = vadd.xlane.f32.xlu0 %v306_v14 }
  0x71   : > { %316 = vadd.xlane.f32.xlu1 %v315_v19 }
  0x72   : > { %313 = vadd.xlane.f32.xlu0 %v312_v20 }
  0x75   : > { %319 = vadd.xlane.f32.xlu1 %v318_v25 }
  0x76   : > { %271 = vadd.xlane.f32.xlu0 %v270_v28 }
  0x79   : > { %322 = vadd.xlane.f32.xlu1 %v321_v31 }
  0x7a   : > { %274 = vadd.xlane.f32.xlu0 %v273_v32 }
  0xca   : > { %v236_v46 = vpop.xlane.xlu1 %235 }
  0xcb   : > { %v230_v48 = vpop.xlane.xlu0 %229  ;;  %v423_v49 = vrot.slane %v236_v46, %v3766_v38  ;;  %v427_v50 = vrot.slane %v236_v46, %v3769_v39  ;;  %v431_v51 = vrot.slane %v236_v46, %v3772_v40  ;;  %v435_v52 = vrot.slane %v236_v46, %v3775_v41 }
  0xcc   : > { %v359_v53 = vrot.slane %v230_v48, %v3766_v38  ;;  %v363_v54 = vrot.slane %v230_v48, %v3769_v39  ;;  %v367_v55 = vrot.slane %v230_v48, %v3772_v40  ;;  %v371_v56 = vrot.slane %v230_v48, %v3775_v41 }
  0xcd   : > { %v375_v57 = vrot.slane %v230_v48, %v3778_v42  ;;  %v379_v58 = vrot.slane %v230_v48, %v3781_v43  ;;  %v383_v59 = vrot.slane %v230_v48, %v3784_v44  ;;  %v387_v60 = vrot.slane %v230_v48, %v3787_v45 }
  0xce   : > { %v3804_v61 = vpop.xlane.xlu1 %238  ;;  %v1380_v62 = vcombine.low %v359_v53, %v363_v54  ;;  %v1381_v63 = vcombine.low %v367_v55, %v371_v56  ;;  %v439_v0 = vrot.slane %v236_v46, %v3778_v42  ;;  %v443_v1 = vrot.slane %v236_v46, %v3781_v43 }
  0xcf   : > { %v233_v2 = vpop.xlane.xlu0 %232  ;;  %v1382_v3 = vcombine.low %v375_v57, %v379_v58  ;;  %v1383_v4 = vcombine.low %v383_v59, %v387_v60  ;;  %v447_v5 = vrot.slane %v236_v46, %v3784_v44  ;;  %v451_v6 = vrot.slane %v236_v46, %v3787_v45 }
  0xd0   : > { %v1390_v7 = vrot.slane %v1380_v62, %v3790_v47  ;;  %v1397_v8 = vrot.slane %v1381_v63, %v3790_v47  ;;  %v391_v9 = vrot.slane %v233_v2, %v3766_v38  ;;  %v395_v10 = vrot.slane %v233_v2, %v3769_v39 }
  0xd1   : > { %v1404_v11 = vrot.slane %v1382_v3, %v3790_v47  ;;  %v1411_v12 = vrot.slane %v1383_v4, %v3790_v47  ;;  %v399_v13 = vrot.slane %v233_v2, %v3772_v40  ;;  %v403_v14 = vrot.slane %v233_v2, %v3775_v41 }
  0xd2   : > { %v3818_v15 = vpop.xlane.xlu1 %244  ;;  %v1412_v16 = vcombine.low %v1390_v7, %v1397_v8  ;;  %v407_v17 = vrot.slane %v233_v2, %v3778_v42  ;;  %v411_v18 = vrot.slane %v233_v2, %v3781_v43  ;;  %v415_v19 = vrot.slane %v233_v2, %v3784_v44 }
  0xd3   : > { %v1413_v20 = vcombine.low %v1404_v11, %v1411_v12  ;;  %v419_v21 = vrot.slane %v233_v2, %v3787_v45  ;;  %v1429_v22 = vcombine.low %v391_v9, %v395_v10  ;;  %v1430_v23 = vcombine.low %v399_v13, %v403_v14 }
  0xd4   : > { %v1420_v24 = vrot.slane %v1412_v16, %v3790_v47  ;;  %v1431_v25 = vcombine.low %v407_v17, %v411_v18  ;;  %v1478_v26 = vcombine.low %v423_v49, %v427_v50  ;;  %v1479_v27 = vcombine.low %v431_v51, %v435_v52 }
  0xd5   : > { %v1427_v28 = vrot.slane %v1413_v20, %v3790_v47  ;;  %v1432_v29 = vcombine.low %v415_v19, %v419_v21  ;;  %v1439_v30 = vrot.slane %v1429_v22, %v3790_v47  ;;  %v1446_v31 = vrot.slane %v1430_v23, %v3790_v47 }
  0xd6   : > { %v3828_v32 = vpop.xlane.xlu1 %250  ;;  %v1453_v34 = vrot.slane %v1431_v25, %v3790_v47  ;;  %v1480_v35 = vcombine.low %v439_v0, %v443_v1  ;;  %v1481_v37 = vcombine.low %v447_v5, %v451_v6  ;;  %v1488_v46 = vrot.slane %v1478_v26, %v3790_v47  ;;  %v242_v6 = vpop.xlane.xlu0 %241 }
  0xd7   : > { %v1428_v48 = vcombine.low %v1420_v24, %v1427_v28  ;;  %v1460_v53 = vrot.slane %v1432_v29, %v3790_v47  ;;  %v1461_v49 = vcombine.low %v1439_v30, %v1446_v31  ;;  %v1495_v50 = vrot.slane %v1479_v27, %v3790_v47 }
  0xd8   : > { %v1502_v51 = vrot.slane %v1480_v35, %v3790_v47  ;;  %v1509_v52 = vrot.slane %v1481_v37, %v3790_v47  ;;  %v455_v54 = vrot.slane %v3804_v61, %v3766_v38  ;;  %v459_v55 = vrot.slane %v3804_v61, %v3769_v39 }
  0xd9   : > { %2949 = vperm.xlu0 %3443, %v1428_v48   ;;  %v1462_v56 = vcombine.low %v1453_v34, %v1460_v53  ;;  %v1469_v57 = vrot.slane %v1461_v49, %v3790_v47  ;;  %v1510_v58 = vcombine.low %v1488_v46, %v1495_v50  ;;  %v463_v59 = vrot.slane %v3804_v61, %v3772_v40 }
  0xda   : > { %v3843_v60 = vpop.xlane.xlu1 %256  ;;  %v1511_v62 = vcombine.low %v1502_v51, %v1509_v52  ;;  %v467_v63 = vrot.slane %v3804_v61, %v3775_v41  ;;  %v471_v0 = vrot.slane %v3804_v61, %v3778_v42  ;;  %v475_v1 = vrot.slane %v3804_v61, %v3781_v43  ;;  %v248_v48 = vpop.xlane.xlu0 %247 }
  0xdb   : > { %v1476_v2 = vrot.slane %v1462_v56, %v3790_v47  ;;  %v1518_v3 = vrot.slane %v1510_v58, %v3790_v47  ;;  %v479_v4 = vrot.slane %v3804_v61, %v3784_v44  ;;  %v483_v5 = vrot.slane %v3804_v61, %v3787_v45 }
  0xdc   : > { %v1525_v7 = vrot.slane %v1511_v62, %v3790_v47  ;;  %v1527_v8 = vcombine.low %v455_v54, %v459_v55  ;;  %v1528_v9 = vcombine.low %v463_v59, %v467_v63  ;;  %v1529_v10 = vcombine.low %v471_v0, %v475_v1 }
  0xdd   : > { %v1477_v11 = vcombine.low %v1469_v57, %v1476_v2  ;;  %v1530_v12 = vcombine.low %v479_v4, %v483_v5  ;;  %v487_v13 = vrot.slane %v242_v6, %v3766_v38  ;;  %v491_v14 = vrot.slane %v242_v6, %v3769_v39 }
  0xde   : > { %v3860_v16 = vpop.xlane.xlu1 %262  ;;  %v1526_v17 = vcombine.low %v1518_v3, %v1525_v7  ;;  %v1537_v18 = vrot.slane %v1527_v8, %v3790_v47  ;;  %v1544_v19 = vrot.slane %v1528_v9, %v3790_v47  ;;  %v1551_v61 = vrot.slane %v1529_v10, %v3790_v47 }
  0xdf   : > { %2952 = vperm.xlu1 %3444, %v1477_v11   ;;  %v1558_v20 = vrot.slane %v1530_v12, %v3790_v47  ;;  %v495_v21 = vrot.slane %v242_v6, %v3772_v40  ;;  %v499_v22 = vrot.slane %v242_v6, %v3775_v41  ;;  %v503_v23 = vrot.slane %v242_v6, %v3778_v42  ;;  %v3902_v12 = vpop.xlane.xlu0 %253 }
  0xe0   : > { %v1559_v24 = vcombine.low %v1537_v18, %v1544_v19  ;;  %v507_v25 = vrot.slane %v242_v6, %v3781_v43  ;;  %v511_v26 = vrot.slane %v242_v6, %v3784_v44  ;;  %v515_v27 = vrot.slane %v242_v6, %v3787_v45 }
  0xe1   : > { %v1560_v28 = vcombine.low %v1551_v61, %v1558_v20  ;;  %v1576_v29 = vcombine.low %v487_v13, %v491_v14  ;;  %v1577_v30 = vcombine.low %v495_v21, %v499_v22  ;;  %v519_v31 = vrot.slane %v3818_v15, %v3766_v38 }
  0xe2   : > { %v1567_v34 = vrot.slane %v1559_v24, %v3790_v47  ;;  %v1578_v35 = vcombine.low %v503_v23, %v507_v25  ;;  %v1579_v37 = vcombine.low %v511_v26, %v515_v27  ;;  %v523_v46 = vrot.slane %v3818_v15, %v3769_v39  ;;  %v3877_v53 = vpop.xlane.xlu1 %268 }
  0xe3   : > { %2955 = vperm.xlu1 %3444, %v1526_v17   ;;  %v1574_v49 = vrot.slane %v1560_v28, %v3790_v47  ;;  %v1586_v50 = vrot.slane %v1576_v29, %v3790_v47  ;;  %v1593_v51 = vrot.slane %v1577_v30, %v3790_v47  ;;  %v527_v52 = vrot.slane %v3818_v15, %v3772_v40 }
  0xe4   : > { %v1600_v54 = vrot.slane %v1578_v35, %v3790_v47  ;;  %v1607_v55 = vrot.slane %v1579_v37, %v3790_v47  ;;  %v531_v56 = vrot.slane %v3818_v15, %v3775_v41  ;;  %v535_v57 = vrot.slane %v3818_v15, %v3778_v42 }
  0xe5   : > { %v1575_v58 = vcombine.low %v1567_v34, %v1574_v49  ;;  %v1608_v59 = vcombine.low %v1586_v50, %v1593_v51  ;;  %v539_v62 = vrot.slane %v3818_v15, %v3781_v43  ;;  %v543_v63 = vrot.slane %v3818_v15, %v3784_v44  ;;  %v3921_v50 = vpop.xlane.xlu0 %259 }
  0xe6   : > { %v1609_v0 = vcombine.low %v1600_v54, %v1607_v55  ;;  %v547_v1 = vrot.slane %v3818_v15, %v3787_v45  ;;  %v1625_v2 = vcombine.low %v519_v31, %v523_v46  ;;  %v1626_v3 = vcombine.low %v527_v52, %v531_v56  ;;  %v281_v15 = vpop.xlane.xlu1 %280 }
  0xe7   : > { %2958 = vperm.xlu1 %3444, %v1575_v58   ;;  %v1616_v4 = vrot.slane %v1608_v59, %v3790_v47  ;;  %v1627_v5 = vcombine.low %v535_v57, %v539_v62  ;;  %v551_v6 = vrot.slane %v248_v48, %v3766_v38  ;;  %v555_v7 = vrot.slane %v248_v48, %v3769_v39 }
  0xe8   : > { %v1623_v8 = vrot.slane %v1609_v0, %v3790_v47  ;;  %v1628_v9 = vcombine.low %v543_v63, %v547_v1  ;;  %v1635_v10 = vrot.slane %v1625_v2, %v3790_v47  ;;  %v1642_v11 = vrot.slane %v1626_v3, %v3790_v47 }
  0xe9   : > { %v1649_v13 = vrot.slane %v1627_v5, %v3790_v47  ;;  %v559_v14 = vrot.slane %v248_v48, %v3772_v40  ;;  %v563_v17 = vrot.slane %v248_v48, %v3775_v41  ;;  %v567_v18 = vrot.slane %v248_v48, %v3778_v42 }
  0xea   : > { %v1624_v19 = vcombine.low %v1616_v4, %v1623_v8  ;;  %v1656_v61 = vrot.slane %v1628_v9, %v3790_v47  ;;  %v1657_v20 = vcombine.low %v1635_v10, %v1642_v11  ;;  %v571_v21 = vrot.slane %v248_v48, %v3781_v43  ;;  %v287_v10 = vpop.xlane.xlu1 %286 }
  0xeb   : > { %v575_v22 = vrot.slane %v248_v48, %v3784_v44  ;;  %v579_v23 = vrot.slane %v248_v48, %v3787_v45  ;;  %v1674_v24 = vcombine.low %v551_v6, %v555_v7  ;;  %v1675_v25 = vcombine.low %v559_v14, %v563_v17  ;;  %v3946_v17 = vpop.xlane.xlu0 %265 }
  0xec   : > { %2961 = vperm.xlu1 %3444, %v1624_v19   ;;  %v1658_v26 = vcombine.low %v1649_v13, %v1656_v61  ;;  %v1665_v27 = vrot.slane %v1657_v20, %v3790_v47  ;;  %v1676_v28 = vcombine.low %v567_v18, %v571_v21  ;;  %v903_v29 = vrot.slane %v281_v15, %v3766_v38 }
  0xed   : > { %v1677_v30 = vcombine.low %v575_v22, %v579_v23  ;;  %v1684_v31 = vrot.slane %v1674_v24, %v3790_v47  ;;  %v1691_v34 = vrot.slane %v1675_v25, %v3790_v47  ;;  %v907_v35 = vrot.slane %v281_v15, %v3769_v39 }
  0xee   : > { %v1672_v37 = vrot.slane %v1658_v26, %v3790_v47  ;;  %v1698_v46 = vrot.slane %v1676_v28, %v3790_v47  ;;  %v911_v48 = vrot.slane %v281_v15, %v3772_v40  ;;  %v915_v49 = vrot.slane %v281_v15, %v3775_v41 }
  0xef   : > { %v1705_v51 = vrot.slane %v1677_v30, %v3790_v47  ;;  %v1706_v52 = vcombine.low %v1684_v31, %v1691_v34  ;;  %v919_v54 = vrot.slane %v281_v15, %v3778_v42  ;;  %v923_v55 = vrot.slane %v281_v15, %v3781_v43 }
  0xf0   : > { %v1673_v56 = vcombine.low %v1665_v27, %v1672_v37  ;;  %v927_v57 = vrot.slane %v281_v15, %v3784_v44  ;;  %v931_v58 = vrot.slane %v281_v15, %v3787_v45  ;;  %v2213_v59 = vcombine.low %v903_v29, %v907_v35 }
  0xf1   : > { %v1707_v62 = vcombine.low %v1698_v46, %v1705_v51  ;;  %v1714_v63 = vrot.slane %v1706_v52, %v3790_v47  ;;  %v2214_v0 = vcombine.low %v911_v48, %v915_v49  ;;  %v2215_v1 = vcombine.low %v919_v54, %v923_v55  ;;  %v278_v54 = vpop.xlane.xlu0 %277 }
  0xf2   : > { %2964 = vperm.xlu1 %3444, %v1673_v56   ;;  %v2216_v2 = vcombine.low %v927_v57, %v931_v58  ;;  %v2223_v3 = vrot.slane %v2213_v59, %v3790_v47  ;;  %v583_v4 = vrot.slane %v3828_v32, %v3766_v38  ;;  %v587_v5 = vrot.slane %v3828_v32, %v3769_v39 }
  0xf3   : > { %v1721_v6 = vrot.slane %v1707_v62, %v3790_v47  ;;  %v2230_v7 = vrot.slane %v2214_v0, %v3790_v47  ;;  %v2237_v8 = vrot.slane %v2215_v1, %v3790_v47  ;;  %v591_v9 = vrot.slane %v3828_v32, %v3772_v40 }
  0xf4   : > { %v2244_v11 = vrot.slane %v2216_v2, %v3790_v47  ;;  %v595_v15 = vrot.slane %v3828_v32, %v3775_v41  ;;  %v599_v13 = vrot.slane %v3828_v32, %v3778_v42  ;;  %v603_v14 = vrot.slane %v3828_v32, %v3781_v43 }
  0xf5   : > { %v1722_v18 = vcombine.low %v1714_v63, %v1721_v6  ;;  %v2245_v19 = vcombine.low %v2223_v3, %v2230_v7  ;;  %v607_v61 = vrot.slane %v3828_v32, %v3784_v44  ;;  %v611_v20 = vrot.slane %v3828_v32, %v3787_v45 }
  0xf6   : > { %v2246_v21 = vcombine.low %v2237_v8, %v2244_v11  ;;  %v1723_v22 = vcombine.low %v583_v4, %v587_v5  ;;  %v1724_v23 = vcombine.low %v591_v9, %v595_v15  ;;  %v1725_v24 = vcombine.low %v599_v13, %v603_v14  ;;  %v293_v5 = vpop.xlane.xlu1 %292 }
  0xf7   : > { %2967 = vperm.xlu1 %3444, %v1722_v18   ;;  %v2253_v25 = vrot.slane %v2245_v19, %v3790_v47  ;;  %v1726_v26 = vcombine.low %v607_v61, %v611_v20  ;;  %v967_v27 = vrot.slane %v287_v10, %v3766_v38  ;;  %v971_v28 = vrot.slane %v287_v10, %v3769_v39 }
  0xf8   : > { %v2260_v29 = vrot.slane %v2246_v21, %v3790_v47  ;;  %v1733_v30 = vrot.slane %v1723_v22, %v3790_v47  ;;  %v1740_v31 = vrot.slane %v1724_v23, %v3790_v47  ;;  %v1747_v32 = vrot.slane %v1725_v24, %v3790_v47 }
  0xf9   : > { %v1754_v34 = vrot.slane %v1726_v26, %v3790_v47  ;;  %v975_v35 = vrot.slane %v287_v10, %v3772_v40  ;;  %v979_v37 = vrot.slane %v287_v10, %v3775_v41  ;;  %v983_v46 = vrot.slane %v287_v10, %v3778_v42 }
  0xfa   : > { %v2261_v48 = vcombine.low %v2253_v25, %v2260_v29  ;;  %v1755_v49 = vcombine.low %v1733_v30, %v1740_v31  ;;  %v987_v51 = vrot.slane %v287_v10, %v3781_v43  ;;  %v991_v52 = vrot.slane %v287_v10, %v3784_v44 }
  0xfb   : > { %v1756_v55 = vcombine.low %v1747_v32, %v1754_v34  ;;  %v995_v56 = vrot.slane %v287_v10, %v3787_v45  ;;  %v2311_v57 = vcombine.low %v967_v27, %v971_v28  ;;  %v2312_v58 = vcombine.low %v975_v35, %v979_v37 }
  0xfc   : > { %3000 = vperm.xlu0 %3443, %v2261_v48   ;;  %v1763_v59 = vrot.slane %v1755_v49, %v3790_v47  ;;  %v2313_v62 = vcombine.low %v983_v46, %v987_v51  ;;  %v871_v63 = vrot.slane %v278_v54, %v3766_v38  ;;  %v875_v0 = vrot.slane %v278_v54, %v3769_v39 }
  0xfd   : > { %v1770_v1 = vrot.slane %v1756_v55, %v3790_v47  ;;  %v2314_v2 = vcombine.low %v991_v52, %v995_v56  ;;  %v2321_v3 = vrot.slane %v2311_v57, %v3790_v47  ;;  %v2328_v4 = vrot.slane %v2312_v58, %v3790_v47  ;;  %v284_v52 = vpop.xlane.xlu0 %283 }
  0xfe   : > { %v2335_v6 = vrot.slane %v2313_v62, %v3790_v47  ;;  %v879_v7 = vrot.slane %v278_v54, %v3772_v40  ;;  %v883_v8 = vrot.slane %v278_v54, %v3775_v41  ;;  %v887_v9 = vrot.slane %v278_v54, %v3778_v42 }
  0xff   : > { %v1771_v10 = vcombine.low %v1763_v59, %v1770_v1  ;;  %v2342_v11 = vrot.slane %v2314_v2, %v3790_v47  ;;  %v2343_v15 = vcombine.low %v2321_v3, %v2328_v4  ;;  %v891_v13 = vrot.slane %v278_v54, %v3781_v43  ;;  %v299_v4 = vpop.xlane.xlu1 %298 }
 0x100   : > { %v895_v14 = vrot.slane %v278_v54, %v3784_v44  ;;  %v899_v18 = vrot.slane %v278_v54, %v3787_v45  ;;  %v2164_v19 = vcombine.low %v871_v63, %v875_v0  ;;  %v2165_v61 = vcombine.low %v879_v7, %v883_v8 }
 0x101   : > { %2970 = vperm.xlu1 %3444, %v1771_v10   ;;  %v2344_v20 = vcombine.low %v2335_v6, %v2342_v11  ;;  %v2351_v21 = vrot.slane %v2343_v15, %v3790_v47  ;;  %v2166_v22 = vcombine.low %v887_v9, %v891_v13  ;;  %v1031_v23 = vrot.slane %v293_v5, %v3766_v38 }
 0x102   : > { %v2167_v24 = vcombine.low %v895_v14, %v899_v18  ;;  %v2174_v25 = vrot.slane %v2164_v19, %v3790_v47  ;;  %v2181_v26 = vrot.slane %v2165_v61, %v3790_v47  ;;  %v1035_v27 = vrot.slane %v293_v5, %v3769_v39 }
 0x103   : > { %v2358_v28 = vrot.slane %v2344_v20, %v3790_v47  ;;  %v2188_v29 = vrot.slane %v2166_v22, %v3790_v47  ;;  %v1039_v30 = vrot.slane %v293_v5, %v3772_v40  ;;  %v1043_v31 = vrot.slane %v293_v5, %v3775_v41 }
 0x104   : > { %v2195_v32 = vrot.slane %v2167_v24, %v3790_v47  ;;  %v2196_v34 = vcombine.low %v2174_v25, %v2181_v26  ;;  %v1047_v35 = vrot.slane %v293_v5, %v3778_v42  ;;  %v1051_v37 = vrot.slane %v293_v5, %v3781_v43 }
 0x105   : > { %v2359_v46 = vcombine.low %v2351_v21, %v2358_v28  ;;  %v1055_v48 = vrot.slane %v293_v5, %v3784_v44  ;;  %v1059_v49 = vrot.slane %v293_v5, %v3787_v45  ;;  %v2409_v51 = vcombine.low %v1031_v23, %v1035_v27  ;;  %v290_v23 = vpop.xlane.xlu0 %289 }
 0x106   : > { %v2197_v54 = vcombine.low %v2188_v29, %v2195_v32  ;;  %v2204_v55 = vrot.slane %v2196_v34, %v3790_v47  ;;  %v2410_v56 = vcombine.low %v1039_v30, %v1043_v31  ;;  %v2411_v57 = vcombine.low %v1047_v35, %v1051_v37 }
 0x107   : > { %3006 = vperm.xlu0 %3443, %v2359_v46   ;;  %v2412_v58 = vcombine.low %v1055_v48, %v1059_v49  ;;  %v2419_v59 = vrot.slane %v2409_v51, %v3790_v47  ;;  %v935_v62 = vrot.slane %v284_v52, %v3766_v38  ;;  %v939_v63 = vrot.slane %v284_v52, %v3769_v39 }
 0x108   : > { %v2211_v0 = vrot.slane %v2197_v54, %v3790_v47  ;;  %v2426_v1 = vrot.slane %v2410_v56, %v3790_v47  ;;  %v2433_v2 = vrot.slane %v2411_v57, %v3790_v47  ;;  %v943_v3 = vrot.slane %v284_v52, %v3772_v40 }
 0x109   : > { %v2440_v5 = vrot.slane %v2412_v58, %v3790_v47  ;;  %v947_v6 = vrot.slane %v284_v52, %v3775_v41  ;;  %v951_v7 = vrot.slane %v284_v52, %v3778_v42  ;;  %v955_v8 = vrot.slane %v284_v52, %v3781_v43 }
 0x10a   : > { %v2212_v9 = vcombine.low %v2204_v55, %v2211_v0  ;;  %v2441_v10 = vcombine.low %v2419_v59, %v2426_v1  ;;  %v959_v11 = vrot.slane %v284_v52, %v3784_v44  ;;  %v963_v15 = vrot.slane %v284_v52, %v3787_v45 }
 0x10b   : > { %v2442_v13 = vcombine.low %v2433_v2, %v2440_v5  ;;  %v2262_v14 = vcombine.low %v935_v62, %v939_v63  ;;  %v2263_v18 = vcombine.low %v943_v3, %v947_v6  ;;  %v2264_v19 = vcombine.low %v951_v7, %v955_v8  ;;  %v296_v63 = vpop.xlane.xlu0 %295 }
 0x10c   : > { %2997 = vperm.xlu1 %3444, %v2212_v9   ;;  %v2449_v61 = vrot.slane %v2441_v10, %v3790_v47  ;;  %v2265_v20 = vcombine.low %v959_v11, %v963_v15  ;;  %v1095_v21 = vrot.slane %v299_v4, %v3766_v38  ;;  %v1099_v22 = vrot.slane %v299_v4, %v3769_v39 }
 0x10d   : > { %v2456_v24 = vrot.slane %v2442_v13, %v3790_v47  ;;  %v2272_v25 = vrot.slane %v2262_v14, %v3790_v47  ;;  %v2279_v26 = vrot.slane %v2263_v18, %v3790_v47  ;;  %v2286_v27 = vrot.slane %v2264_v19, %v3790_v47 }
 0x10e   : > { %v2293_v28 = vrot.slane %v2265_v20, %v3790_v47  ;;  %v1103_v29 = vrot.slane %v299_v4, %v3772_v40  ;;  %v1107_v30 = vrot.slane %v299_v4, %v3775_v41  ;;  %v1111_v31 = vrot.slane %v299_v4, %v3778_v42 }
 0x10f   : > { %v2457_v32 = vcombine.low %v2449_v61, %v2456_v24  ;;  %v2294_v34 = vcombine.low %v2272_v25, %v2279_v26  ;;  %v1115_v35 = vrot.slane %v299_v4, %v3781_v43  ;;  %v1119_v37 = vrot.slane %v299_v4, %v3784_v44  ;;  %v302_v26 = vpop.xlane.xlu0 %301 }
 0x110   : > { %v2295_v46 = vcombine.low %v2286_v27, %v2293_v28  ;;  %v1123_v48 = vrot.slane %v299_v4, %v3787_v45  ;;  %v2507_v49 = vcombine.low %v1095_v21, %v1099_v22  ;;  %v2508_v51 = vcombine.low %v1103_v29, %v1107_v30 }
 0x111   : > { %3012 = vperm.xlu0 %3443, %v2457_v32   ;;  %v2302_v52 = vrot.slane %v2294_v34, %v3790_v47  ;;  %v2509_v54 = vcombine.low %v1111_v31, %v1115_v35  ;;  %v999_v55 = vrot.slane %v290_v23, %v3766_v38  ;;  %v1003_v56 = vrot.slane %v290_v23, %v3769_v39 }
 0x112   : > { %v2309_v57 = vrot.slane %v2295_v46, %v3790_v47  ;;  %v2510_v58 = vcombine.low %v1119_v37, %v1123_v48  ;;  %v2517_v59 = vrot.slane %v2507_v49, %v3790_v47  ;;  %v2524_v62 = vrot.slane %v2508_v51, %v3790_v47 }
 0x113   : > { %v2531_v0 = vrot.slane %v2509_v54, %v3790_v47  ;;  %v1007_v1 = vrot.slane %v290_v23, %v3772_v40  ;;  %v1011_v2 = vrot.slane %v290_v23, %v3775_v41  ;;  %v1015_v3 = vrot.slane %v290_v23, %v3778_v42 }
 0x114   : > { %v2310_v4 = vcombine.low %v2302_v52, %v2309_v57  ;;  %v2538_v5 = vrot.slane %v2510_v58, %v3790_v47  ;;  %v2539_v6 = vcombine.low %v2517_v59, %v2524_v62  ;;  %v1019_v7 = vrot.slane %v290_v23, %v3781_v43 }
 0x115   : > { %v1023_v8 = vrot.slane %v290_v23, %v3784_v44  ;;  %v1027_v9 = vrot.slane %v290_v23, %v3787_v45  ;;  %v2360_v10 = vcombine.low %v999_v55, %v1003_v56  ;;  %v2361_v11 = vcombine.low %v1007_v1, %v1011_v2 }
 0x116   : > { %3003 = vperm.xlu1 %3444, %v2310_v4   ;;  %v2540_v15 = vcombine.low %v2531_v0, %v2538_v5  ;;  %v2547_v13 = vrot.slane %v2539_v6, %v3790_v47  ;;  %v2362_v14 = vcombine.low %v1015_v3, %v1019_v7  ;;  %v1063_v18 = vrot.slane %v296_v63, %v3766_v38 }
 0x117   : > { %v2363_v19 = vcombine.low %v1023_v8, %v1027_v9  ;;  %v2370_v61 = vrot.slane %v2360_v10, %v3790_v47  ;;  %v2377_v20 = vrot.slane %v2361_v11, %v3790_v47  ;;  %v1067_v21 = vrot.slane %v296_v63, %v3769_v39 }
 0x118   : > { %v2554_v22 = vrot.slane %v2540_v15, %v3790_v47  ;;  %v2384_v23 = vrot.slane %v2362_v14, %v3790_v47  ;;  %v1071_v24 = vrot.slane %v296_v63, %v3772_v40  ;;  %v1075_v25 = vrot.slane %v296_v63, %v3775_v41 }
 0x119   : > { %v2391_v27 = vrot.slane %v2363_v19, %v3790_v47  ;;  %v2392_v28 = vcombine.low %v2370_v61, %v2377_v20  ;;  %v1079_v29 = vrot.slane %v296_v63, %v3778_v42  ;;  %v1083_v30 = vrot.slane %v296_v63, %v3781_v43  ;;  %v305_v20 = vpop.xlane.xlu1 %304 }
 0x11a   : > { %v2555_v31 = vcombine.low %v2547_v13, %v2554_v22  ;;  %v1087_v32 = vrot.slane %v296_v63, %v3784_v44  ;;  %v1091_v34 = vrot.slane %v296_v63, %v3787_v45  ;;  %v2458_v35 = vcombine.low %v1063_v18, %v1067_v21 }
 0x11b   : > { %v2393_v37 = vcombine.low %v2384_v23, %v2391_v27  ;;  %v2400_v46 = vrot.slane %v2392_v28, %v3790_v47  ;;  %v2459_v48 = vcombine.low %v1071_v24, %v1075_v25  ;;  %v2460_v49 = vcombine.low %v1079_v29, %v1083_v30 }
 0x11c   : > { %3018 = vperm.xlu0 %3443, %v2555_v31   ;;  %v2461_v51 = vcombine.low %v1087_v32, %v1091_v34  ;;  %v2468_v52 = vrot.slane %v2458_v35, %v3790_v47  ;;  %v1127_v54 = vrot.slane %v302_v26, %v3766_v38  ;;  %v1131_v55 = vrot.slane %v302_v26, %v3769_v39 }
 0x11d   : > { %v2407_v56 = vrot.slane %v2393_v37, %v3790_v47  ;;  %v2475_v57 = vrot.slane %v2459_v48, %v3790_v47  ;;  %v2482_v58 = vrot.slane %v2460_v49, %v3790_v47  ;;  %v1135_v59 = vrot.slane %v302_v26, %v3772_v40 }
 0x11e   : > { %v2489_v62 = vrot.slane %v2461_v51, %v3790_v47  ;;  %v1139_v63 = vrot.slane %v302_v26, %v3775_v41  ;;  %v1143_v0 = vrot.slane %v302_v26, %v3778_v42  ;;  %v1147_v1 = vrot.slane %v302_v26, %v3781_v43 }
 0x11f   : > { %v2408_v2 = vcombine.low %v2400_v46, %v2407_v56  ;;  %v2490_v3 = vcombine.low %v2468_v52, %v2475_v57  ;;  %v1151_v4 = vrot.slane %v302_v26, %v3784_v44  ;;  %v1155_v5 = vrot.slane %v302_v26, %v3787_v45 }
 0x120   : > { %v2491_v6 = vcombine.low %v2482_v58, %v2489_v62  ;;  %v2556_v7 = vcombine.low %v1127_v54, %v1131_v55  ;;  %v2557_v8 = vcombine.low %v1135_v59, %v1139_v63  ;;  %v2558_v9 = vcombine.low %v1143_v0, %v1147_v1 }
 0x121   : > { %3009 = vperm.xlu1 %3444, %v2408_v2   ;;  %v2498_v10 = vrot.slane %v2490_v3, %v3790_v47  ;;  %v2559_v11 = vcombine.low %v1151_v4, %v1155_v5  ;;  %v615_v15 = vrot.slane %v3902_v12, %v3766_v38  ;;  %v619_v13 = vrot.slane %v3902_v12, %v3769_v39 }
 0x122   : > { %v2505_v14 = vrot.slane %v2491_v6, %v3790_v47  ;;  %v2566_v18 = vrot.slane %v2556_v7, %v3790_v47  ;;  %v2573_v19 = vrot.slane %v2557_v8, %v3790_v47  ;;  %v2580_v61 = vrot.slane %v2558_v9, %v3790_v47 }
 0x123   : > { %v2587_v21 = vrot.slane %v2559_v11, %v3790_v47  ;;  %v623_v22 = vrot.slane %v3902_v12, %v3772_v40  ;;  %v627_v23 = vrot.slane %v3902_v12, %v3775_v41  ;;  %v631_v24 = vrot.slane %v3902_v12, %v3778_v42 }
 0x124   : > { %v2506_v25 = vcombine.low %v2498_v10, %v2505_v14  ;;  %v2588_v26 = vcombine.low %v2566_v18, %v2573_v19  ;;  %v635_v27 = vrot.slane %v3902_v12, %v3781_v43  ;;  %v639_v28 = vrot.slane %v3902_v12, %v3784_v44  ;;  %v308_v18 = vpop.xlane.xlu0 %307 }
 0x125   : > { %v2589_v29 = vcombine.low %v2580_v61, %v2587_v21  ;;  %v643_v30 = vrot.slane %v3902_v12, %v3787_v45  ;;  %v1772_v31 = vcombine.low %v615_v15, %v619_v13  ;;  %v1773_v32 = vcombine.low %v623_v22, %v627_v23 }
 0x126   : > { %3015 = vperm.xlu1 %3444, %v2506_v25   ;;  %v2596_v34 = vrot.slane %v2588_v26, %v3790_v47  ;;  %v1774_v35 = vcombine.low %v631_v24, %v635_v27  ;;  %v1159_v37 = vrot.slane %v305_v20, %v3766_v38  ;;  %v1163_v46 = vrot.slane %v305_v20, %v3769_v39 }
 0x127   : > { %v2603_v48 = vrot.slane %v2589_v29, %v3790_v47  ;;  %v1775_v49 = vcombine.low %v639_v28, %v643_v30  ;;  %v1782_v51 = vrot.slane %v1772_v31, %v3790_v47  ;;  %v1789_v52 = vrot.slane %v1773_v32, %v3790_v47 }
 0x128   : > { %v1796_v54 = vrot.slane %v1774_v35, %v3790_v47  ;;  %v1167_v12 = vrot.slane %v305_v20, %v3772_v40  ;;  %v1171_v55 = vrot.slane %v305_v20, %v3775_v41  ;;  %v1175_v56 = vrot.slane %v305_v20, %v3778_v42 }
 0x129   : > { %v2604_v57 = vcombine.low %v2596_v34, %v2603_v48  ;;  %v1803_v58 = vrot.slane %v1775_v49, %v3790_v47  ;;  %v1804_v59 = vcombine.low %v1782_v51, %v1789_v52  ;;  %v1179_v62 = vrot.slane %v305_v20, %v3781_v43 }
 0x12a   : > { %v1183_v63 = vrot.slane %v305_v20, %v3784_v44  ;;  %v1187_v0 = vrot.slane %v305_v20, %v3787_v45  ;;  %v2605_v1 = vcombine.low %v1159_v37, %v1163_v46  ;;  %v2606_v2 = vcombine.low %v1167_v12, %v1171_v55 }
 0x12b   : > { %3021 = vperm.xlu0 %3443, %v2604_v57   ;;  %v1805_v3 = vcombine.low %v1796_v54, %v1803_v58  ;;  %v1812_v4 = vrot.slane %v1804_v59, %v3790_v47  ;;  %v2607_v5 = vcombine.low %v1175_v56, %v1179_v62  ;;  %v647_v6 = vrot.slane %v3843_v60, %v3766_v38 }
 0x12c   : > { %v2608_v7 = vcombine.low %v1183_v63, %v1187_v0  ;;  %v2615_v8 = vrot.slane %v2605_v1, %v3790_v47  ;;  %v2622_v9 = vrot.slane %v2606_v2, %v3790_v47  ;;  %v651_v10 = vrot.slane %v3843_v60, %v3769_v39 }
 0x12d   : > { %v1819_v11 = vrot.slane %v1805_v3, %v3790_v47  ;;  %v2629_v15 = vrot.slane %v2607_v5, %v3790_v47  ;;  %v655_v13 = vrot.slane %v3843_v60, %v3772_v40  ;;  %v659_v14 = vrot.slane %v3843_v60, %v3775_v41 }
 0x12e   : > { %v2636_v19 = vrot.slane %v2608_v7, %v3790_v47  ;;  %v2637_v61 = vcombine.low %v2615_v8, %v2622_v9  ;;  %v663_v20 = vrot.slane %v3843_v60, %v3778_v42  ;;  %v667_v21 = vrot.slane %v3843_v60, %v3781_v43  ;;  %v311_v7 = vpop.xlane.xlu1 %310 }
 0x12f   : > { %v1820_v22 = vcombine.low %v1812_v4, %v1819_v11  ;;  %v671_v23 = vrot.slane %v3843_v60, %v3784_v44  ;;  %v675_v24 = vrot.slane %v3843_v60, %v3787_v45  ;;  %v1821_v25 = vcombine.low %v647_v6, %v651_v10 }
 0x130   : > { %v2638_v26 = vcombine.low %v2629_v15, %v2636_v19  ;;  %v2645_v27 = vrot.slane %v2637_v61, %v3790_v47  ;;  %v1822_v28 = vcombine.low %v655_v13, %v659_v14  ;;  %v1823_v29 = vcombine.low %v663_v20, %v667_v21 }
 0x131   : > { %2973 = vperm.xlu1 %3444, %v1820_v22   ;;  %v1824_v30 = vcombine.low %v671_v23, %v675_v24  ;;  %v1831_v31 = vrot.slane %v1821_v25, %v3790_v47  ;;  %v1191_v32 = vrot.slane %v308_v18, %v3766_v38  ;;  %v1195_v34 = vrot.slane %v308_v18, %v3769_v39 }
 0x132   : > { %v2652_v35 = vrot.slane %v2638_v26, %v3790_v47  ;;  %v1838_v37 = vrot.slane %v1822_v28, %v3790_v47  ;;  %v1845_v60 = vrot.slane %v1823_v29, %v3790_v47  ;;  %v1199_v46 = vrot.slane %v308_v18, %v3772_v40 }
 0x133   : > { %v1852_v48 = vrot.slane %v1824_v30, %v3790_v47  ;;  %v1203_v49 = vrot.slane %v308_v18, %v3775_v41  ;;  %v1207_v51 = vrot.slane %v308_v18, %v3778_v42  ;;  %v1211_v52 = vrot.slane %v308_v18, %v3781_v43 }
 0x134   : > { %v2653_v54 = vcombine.low %v2645_v27, %v2652_v35  ;;  %v1853_v12 = vcombine.low %v1831_v31, %v1838_v37  ;;  %v1215_v55 = vrot.slane %v308_v18, %v3784_v44  ;;  %v1219_v56 = vrot.slane %v308_v18, %v3787_v45 }
 0x135   : > { %v1854_v57 = vcombine.low %v1845_v60, %v1852_v48  ;;  %v2654_v58 = vcombine.low %v1191_v32, %v1195_v34  ;;  %v2655_v59 = vcombine.low %v1199_v46, %v1203_v49  ;;  %v2656_v62 = vcombine.low %v1207_v51, %v1211_v52 }
 0x136   : > { %3024 = vperm.xlu0 %3443, %v2653_v54   ;;  %v1861_v63 = vrot.slane %v1853_v12, %v3790_v47  ;;  %v2657_v0 = vcombine.low %v1215_v55, %v1219_v56  ;;  %v679_v1 = vrot.slane %v3921_v50, %v3766_v38  ;;  %v683_v2 = vrot.slane %v3921_v50, %v3769_v39 }
 0x137   : > { %v1868_v3 = vrot.slane %v1854_v57, %v3790_v47  ;;  %v2664_v4 = vrot.slane %v2654_v58, %v3790_v47  ;;  %v2671_v5 = vrot.slane %v2655_v59, %v3790_v47  ;;  %v2678_v6 = vrot.slane %v2656_v62, %v3790_v47 }
 0x138   : > { %v2685_v8 = vrot.slane %v2657_v0, %v3790_v47  ;;  %v687_v9 = vrot.slane %v3921_v50, %v3772_v40  ;;  %v691_v10 = vrot.slane %v3921_v50, %v3775_v41  ;;  %v695_v11 = vrot.slane %v3921_v50, %v3778_v42 }
 0x139   : > { %v1869_v15 = vcombine.low %v1861_v63, %v1868_v3  ;;  %v2686_v13 = vcombine.low %v2664_v4, %v2671_v5  ;;  %v699_v14 = vrot.slane %v3921_v50, %v3781_v43  ;;  %v703_v18 = vrot.slane %v3921_v50, %v3784_v44 }
 0x13a   : > { %v2687_v19 = vcombine.low %v2678_v6, %v2685_v8  ;;  %v707_v61 = vrot.slane %v3921_v50, %v3787_v45  ;;  %v1870_v20 = vcombine.low %v679_v1, %v683_v2  ;;  %v1871_v21 = vcombine.low %v687_v9, %v691_v10  ;;  %v314_v2 = vpop.xlane.xlu0 %313 }
 0x13b   : > { %2976 = vperm.xlu1 %3444, %v1869_v15   ;;  %v2694_v22 = vrot.slane %v2686_v13, %v3790_v47  ;;  %v1872_v23 = vcombine.low %v695_v11, %v699_v14  ;;  %v1223_v24 = vrot.slane %v311_v7, %v3766_v38  ;;  %v1227_v25 = vrot.slane %v311_v7, %v3769_v39 }
 0x13c   : > { %v2701_v26 = vrot.slane %v2687_v19, %v3790_v47  ;;  %v1873_v27 = vcombine.low %v703_v18, %v707_v61  ;;  %v1880_v28 = vrot.slane %v1870_v20, %v3790_v47  ;;  %v1887_v29 = vrot.slane %v1871_v21, %v3790_v47 }
 0x13d   : > { %v1894_v30 = vrot.slane %v1872_v23, %v3790_v47  ;;  %v1231_v50 = vrot.slane %v311_v7, %v3772_v40  ;;  %v1235_v31 = vrot.slane %v311_v7, %v3775_v41  ;;  %v1239_v32 = vrot.slane %v311_v7, %v3778_v42 }
 0x13e   : > { %v2702_v34 = vcombine.low %v2694_v22, %v2701_v26  ;;  %v1901_v35 = vrot.slane %v1873_v27, %v3790_v47  ;;  %v1902_v37 = vcombine.low %v1880_v28, %v1887_v29  ;;  %v1243_v60 = vrot.slane %v311_v7, %v3781_v43 }
 0x13f   : > { %v1247_v46 = vrot.slane %v311_v7, %v3784_v44  ;;  %v1251_v48 = vrot.slane %v311_v7, %v3787_v45  ;;  %v2703_v49 = vcombine.low %v1223_v24, %v1227_v25  ;;  %v2704_v51 = vcombine.low %v1231_v50, %v1235_v31 }
 0x140   : > { %3027 = vperm.xlu0 %3443, %v2702_v34   ;;  %v1903_v52 = vcombine.low %v1894_v30, %v1901_v35  ;;  %v1910_v54 = vrot.slane %v1902_v37, %v3790_v47  ;;  %v2705_v12 = vcombine.low %v1239_v32, %v1243_v60  ;;  %v711_v55 = vrot.slane %v3860_v16, %v3766_v38 }
 0x141   : > { %v2706_v56 = vcombine.low %v1247_v46, %v1251_v48  ;;  %v2713_v57 = vrot.slane %v2703_v49, %v3790_v47  ;;  %v2720_v58 = vrot.slane %v2704_v51, %v3790_v47  ;;  %v715_v59 = vrot.slane %v3860_v16, %v3769_v39 }
 0x142   : > { %v1917_v62 = vrot.slane %v1903_v52, %v3790_v47  ;;  %v2727_v63 = vrot.slane %v2705_v12, %v3790_v47  ;;  %v719_v0 = vrot.slane %v3860_v16, %v3772_v40  ;;  %v723_v1 = vrot.slane %v3860_v16, %v3775_v41  ;;  %v317_v12 = vpop.xlane.xlu1 %316 }
 0x143   : > { %v2734_v3 = vrot.slane %v2706_v56, %v3790_v47  ;;  %v2735_v4 = vcombine.low %v2713_v57, %v2720_v58  ;;  %v727_v5 = vrot.slane %v3860_v16, %v3778_v42  ;;  %v731_v6 = vrot.slane %v3860_v16, %v3781_v43 }
 0x144   : > { %v1918_v7 = vcombine.low %v1910_v54, %v1917_v62  ;;  %v735_v8 = vrot.slane %v3860_v16, %v3784_v44  ;;  %v739_v9 = vrot.slane %v3860_v16, %v3787_v45  ;;  %v1919_v10 = vcombine.low %v711_v55, %v715_v59 }
 0x145   : > { %v2736_v11 = vcombine.low %v2727_v63, %v2734_v3  ;;  %v2743_v15 = vrot.slane %v2735_v4, %v3790_v47  ;;  %v1920_v13 = vcombine.low %v719_v0, %v723_v1  ;;  %v1921_v14 = vcombine.low %v727_v5, %v731_v6 }
 0x146   : > { %2979 = vperm.xlu1 %3444, %v1918_v7   ;;  %v1922_v18 = vcombine.low %v735_v8, %v739_v9  ;;  %v1929_v19 = vrot.slane %v1919_v10, %v3790_v47  ;;  %v1255_v61 = vrot.slane %v314_v2, %v3766_v38  ;;  %v1259_v20 = vrot.slane %v314_v2, %v3769_v39 }
 0x147   : > { %v2750_v21 = vrot.slane %v2736_v11, %v3790_v47  ;;  %v1936_v22 = vrot.slane %v1920_v13, %v3790_v47  ;;  %v1943_v16 = vrot.slane %v1921_v14, %v3790_v47  ;;  %v1263_v23 = vrot.slane %v314_v2, %v3772_v40 }
 0x148   : > { %v1950_v24 = vrot.slane %v1922_v18, %v3790_v47  ;;  %v1267_v25 = vrot.slane %v314_v2, %v3775_v41  ;;  %v1271_v26 = vrot.slane %v314_v2, %v3778_v42  ;;  %v1275_v27 = vrot.slane %v314_v2, %v3781_v43 }
 0x149   : > { %v2751_v28 = vcombine.low %v2743_v15, %v2750_v21  ;;  %v1951_v29 = vcombine.low %v1929_v19, %v1936_v22  ;;  %v1279_v30 = vrot.slane %v314_v2, %v3784_v44  ;;  %v1283_v50 = vrot.slane %v314_v2, %v3787_v45 }
 0x14a   : > { %v1952_v31 = vcombine.low %v1943_v16, %v1950_v24  ;;  %v2752_v32 = vcombine.low %v1255_v61, %v1259_v20  ;;  %v2753_v34 = vcombine.low %v1263_v23, %v1267_v25  ;;  %v2754_v35 = vcombine.low %v1271_v26, %v1275_v27 }
 0x14b   : > { %3030 = vperm.xlu0 %3443, %v2751_v28   ;;  %v1959_v37 = vrot.slane %v1951_v29, %v3790_v47  ;;  %v2755_v60 = vcombine.low %v1279_v30, %v1283_v50  ;;  %v743_v46 = vrot.slane %v3946_v17, %v3766_v38  ;;  %v747_v48 = vrot.slane %v3946_v17, %v3769_v39 }
 0x14c   : > { %v1966_v49 = vrot.slane %v1952_v31, %v3790_v47  ;;  %v2762_v51 = vrot.slane %v2752_v32, %v3790_v47  ;;  %v2769_v52 = vrot.slane %v2753_v34, %v3790_v47  ;;  %v2776_v54 = vrot.slane %v2754_v35, %v3790_v47  ;;  %v320_v32 = vpop.xlane.xlu1 %319 }
 0x14d   : > { %v2783_v55 = vrot.slane %v2755_v60, %v3790_v47  ;;  %v751_v56 = vrot.slane %v3946_v17, %v3772_v40  ;;  %v755_v57 = vrot.slane %v3946_v17, %v3775_v41  ;;  %v759_v58 = vrot.slane %v3946_v17, %v3778_v42 }
 0x14e   : > { %v1967_v59 = vcombine.low %v1959_v37, %v1966_v49  ;;  %v2784_v62 = vcombine.low %v2762_v51, %v2769_v52  ;;  %v763_v63 = vrot.slane %v3946_v17, %v3781_v43  ;;  %v767_v0 = vrot.slane %v3946_v17, %v3784_v44 }
 0x14f   : > { %v2785_v1 = vcombine.low %v2776_v54, %v2783_v55  ;;  %v771_v2 = vrot.slane %v3946_v17, %v3787_v45  ;;  %v1968_v3 = vcombine.low %v743_v46, %v747_v48  ;;  %v1969_v4 = vcombine.low %v751_v56, %v755_v57 }
 0x150   : > { %2982 = vperm.xlu1 %3444, %v1967_v59   ;;  %v2792_v5 = vrot.slane %v2784_v62, %v3790_v47  ;;  %v1970_v6 = vcombine.low %v759_v58, %v763_v63  ;;  %v1287_v7 = vrot.slane %v317_v12, %v3766_v38  ;;  %v1291_v8 = vrot.slane %v317_v12, %v3769_v39 }
 0x151   : > { %v2799_v9 = vrot.slane %v2785_v1, %v3790_v47  ;;  %v1971_v10 = vcombine.low %v767_v0, %v771_v2  ;;  %v1978_v11 = vrot.slane %v1968_v3, %v3790_v47  ;;  %v1985_v15 = vrot.slane %v1969_v4, %v3790_v47 }
 0x152   : > { %v1992_v13 = vrot.slane %v1970_v6, %v3790_v47  ;;  %v1295_v17 = vrot.slane %v317_v12, %v3772_v40  ;;  %v1299_v14 = vrot.slane %v317_v12, %v3775_v41  ;;  %v1303_v18 = vrot.slane %v317_v12, %v3778_v42 }
 0x153   : > { %v2800_v19 = vcombine.low %v2792_v5, %v2799_v9  ;;  %v1999_v61 = vrot.slane %v1971_v10, %v3790_v47  ;;  %v2000_v20 = vcombine.low %v1978_v11, %v1985_v15  ;;  %v1307_v21 = vrot.slane %v317_v12, %v3781_v43  ;;  %v323_v5 = vpop.xlane.xlu1 %322 }
 0x154   : > { %v1311_v22 = vrot.slane %v317_v12, %v3784_v44  ;;  %v1315_v16 = vrot.slane %v317_v12, %v3787_v45  ;;  %v2801_v23 = vcombine.low %v1287_v7, %v1291_v8  ;;  %v2802_v24 = vcombine.low %v1295_v17, %v1299_v14 }
 0x155   : > { %3033 = vperm.xlu0 %3443, %v2800_v19   ;;  %v2001_v25 = vcombine.low %v1992_v13, %v1999_v61  ;;  %v2008_v26 = vrot.slane %v2000_v20, %v3790_v47  ;;  %v2803_v27 = vcombine.low %v1303_v18, %v1307_v21  ;;  %v775_v28 = vrot.slane %v3877_v53, %v3766_v38 }
 0x156   : > { %v2804_v29 = vcombine.low %v1311_v22, %v1315_v16  ;;  %v2811_v30 = vrot.slane %v2801_v23, %v3790_v47  ;;  %v2818_v50 = vrot.slane %v2802_v24, %v3790_v47  ;;  %v779_v31 = vrot.slane %v3877_v53, %v3769_v39  ;;  %v272_v16 = vpop.xlane.xlu0 %271 }
 0x157   : > { %v2015_v34 = vrot.slane %v2001_v25, %v3790_v47  ;;  %v2825_v35 = vrot.slane %v2803_v27, %v3790_v47  ;;  %v783_v37 = vrot.slane %v3877_v53, %v3772_v40  ;;  %v787_v60 = vrot.slane %v3877_v53, %v3775_v41 }
 0x158   : > { %v2832_v46 = vrot.slane %v2804_v29, %v3790_v47  ;;  %v2833_v48 = vcombine.low %v2811_v30, %v2818_v50  ;;  %v791_v49 = vrot.slane %v3877_v53, %v3778_v42  ;;  %v795_v51 = vrot.slane %v3877_v53, %v3781_v43 }
 0x159   : > { %v2016_v52 = vcombine.low %v2008_v26, %v2015_v34  ;;  %v799_v54 = vrot.slane %v3877_v53, %v3784_v44  ;;  %v803_v12 = vrot.slane %v3877_v53, %v3787_v45  ;;  %v2017_v55 = vcombine.low %v775_v28, %v779_v31 }
 0x15a   : > { %v2834_v56 = vcombine.low %v2825_v35, %v2832_v46  ;;  %v2841_v57 = vrot.slane %v2833_v48, %v3790_v47  ;;  %v2018_v58 = vcombine.low %v783_v37, %v787_v60  ;;  %v2019_v59 = vcombine.low %v791_v49, %v795_v51 }
 0x15b   : > { %2985 = vperm.xlu1 %3444, %v2016_v52   ;;  %v2020_v62 = vcombine.low %v799_v54, %v803_v12  ;;  %v2027_v63 = vrot.slane %v2017_v55, %v3790_v47  ;;  %v1319_v0 = vrot.slane %v320_v32, %v3766_v38  ;;  %v1323_v1 = vrot.slane %v320_v32, %v3769_v39 }
 0x15c   : > { %v2848_v2 = vrot.slane %v2834_v56, %v3790_v47  ;;  %v2034_v3 = vrot.slane %v2018_v58, %v3790_v47  ;;  %v2041_v53 = vrot.slane %v2019_v59, %v3790_v47  ;;  %v1327_v4 = vrot.slane %v320_v32, %v3772_v40 }
 0x15d   : > { %v2048_v6 = vrot.slane %v2020_v62, %v3790_v47  ;;  %v1331_v7 = vrot.slane %v320_v32, %v3775_v41  ;;  %v1335_v8 = vrot.slane %v320_v32, %v3778_v42  ;;  %v1339_v9 = vrot.slane %v320_v32, %v3781_v43 }
 0x15e   : > { %v2849_v10 = vcombine.low %v2841_v57, %v2848_v2  ;;  %v2049_v11 = vcombine.low %v2027_v63, %v2034_v3  ;;  %v1343_v15 = vrot.slane %v320_v32, %v3784_v44  ;;  %v1347_v13 = vrot.slane %v320_v32, %v3787_v45  ;;  %v275_v57 = vpop.xlane.xlu0 %274 }
 0x15f   : > { %v2050_v17 = vcombine.low %v2041_v53, %v2048_v6  ;;  %v2850_v14 = vcombine.low %v1319_v0, %v1323_v1  ;;  %v2851_v18 = vcombine.low %v1327_v4, %v1331_v7  ;;  %v2852_v19 = vcombine.low %v1335_v8, %v1339_v9 }
 0x160   : > { %3036 = vperm.xlu0 %3443, %v2849_v10   ;;  %v2057_v61 = vrot.slane %v2049_v11, %v3790_v47  ;;  %v2853_v20 = vcombine.low %v1343_v15, %v1347_v13  ;;  %v1351_v21 = vrot.slane %v323_v5, %v3766_v38  ;;  %v1355_v22 = vrot.slane %v323_v5, %v3769_v39 }
 0x161   : > { %v2064_v23 = vrot.slane %v2050_v17, %v3790_v47  ;;  %v2860_v24 = vrot.slane %v2850_v14, %v3790_v47  ;;  %v2867_v25 = vrot.slane %v2851_v18, %v3790_v47  ;;  %v2874_v26 = vrot.slane %v2852_v19, %v3790_v47 }
 0x162   : > { %v2881_v27 = vrot.slane %v2853_v20, %v3790_v47  ;;  %v1359_v28 = vrot.slane %v323_v5, %v3772_v40  ;;  %v1363_v29 = vrot.slane %v323_v5, %v3775_v41  ;;  %v1367_v30 = vrot.slane %v323_v5, %v3778_v42 }
 0x163   : > { %v2065_v50 = vcombine.low %v2057_v61, %v2064_v23  ;;  %v2882_v31 = vcombine.low %v2860_v24, %v2867_v25  ;;  %v1371_v32 = vrot.slane %v323_v5, %v3781_v43  ;;  %v1375_v34 = vrot.slane %v323_v5, %v3784_v44 }
 0x164   : > { %v2883_v35 = vcombine.low %v2874_v26, %v2881_v27  ;;  %v1379_v37 = vrot.slane %v323_v5, %v3787_v45  ;;  %v2899_v60 = vcombine.low %v1351_v21, %v1355_v22  ;;  %v2900_v46 = vcombine.low %v1359_v28, %v1363_v29 }
 0x165   : > { %2988 = vperm.xlu1 %3444, %v2065_v50   ;;  %v2890_v48 = vrot.slane %v2882_v31, %v3790_v47  ;;  %v2901_v49 = vcombine.low %v1367_v30, %v1371_v32  ;;  %v807_v51 = vrot.slane %v272_v16, %v3766_v38  ;;  %v811_v52 = vrot.slane %v272_v16, %v3769_v39 }
 0x166   : > { %v2897_v54 = vrot.slane %v2883_v35, %v3790_v47  ;;  %v2902_v12 = vcombine.low %v1375_v34, %v1379_v37  ;;  %v2909_v55 = vrot.slane %v2899_v60, %v3790_v47  ;;  %v2916_v56 = vrot.slane %v2900_v46, %v3790_v47  ;;  %v2953_v60 = vpop.permute.xlu1 %2952 }
 0x167   : > { %v2923_v58 = vrot.slane %v2901_v49, %v3790_v47  ;;  %v815_v59 = vrot.slane %v272_v16, %v3772_v40  ;;  %v819_v62 = vrot.slane %v272_v16, %v3775_v41  ;;  %v823_v63 = vrot.slane %v272_v16, %v3778_v42 }
 0x168   : > { %v2898_v0 = vcombine.low %v2890_v48, %v2897_v54  ;;  %v2930_v1 = vrot.slane %v2902_v12, %v3790_v47  ;;  %v2931_v2 = vcombine.low %v2909_v55, %v2916_v56  ;;  %v827_v3 = vrot.slane %v272_v16, %v3781_v43  ;;  %v2950_v54 = vpop.permute.xlu0 %2949 }
 0x169   : > { %v831_v53 = vrot.slane %v272_v16, %v3784_v44  ;;  %v835_v4 = vrot.slane %v272_v16, %v3787_v45  ;;  %v2066_v5 = vcombine.low %v807_v51, %v811_v52  ;;  %v2067_v6 = vcombine.low %v815_v59, %v819_v62 }
 0x16a   : > { %3039 = vperm.xlu0 %3443, %v2898_v0   ;;  %v2932_v7 = vcombine.low %v2923_v58, %v2930_v1  ;;  %v2939_v8 = vrot.slane %v2931_v2, %v3790_v47  ;;  %v2068_v9 = vcombine.low %v823_v63, %v827_v3  ;;  %v839_v10 = vrot.slane %v275_v57, %v3766_v38  ;;  %v2956_v46 = vpop.permute.xlu1 %2955 }
 0x16b   : > { %v2069_v11 = vcombine.low %v831_v53, %v835_v4  ;;  %v2076_v15 = vrot.slane %v2066_v5, %v3790_v47  ;;  %v2083_v13 = vrot.slane %v2067_v6, %v3790_v47  ;;  %v843_v17 = vrot.slane %v275_v57, %v3769_v39 }
 0x16c   : > { %v2946_v14 = vrot.slane %v2932_v7, %v3790_v47  ;;  %v2090_v18 = vrot.slane %v2068_v9, %v3790_v47  ;;  %v847_v19 = vrot.slane %v275_v57, %v3772_v40  ;;  %v851_v61 = vrot.slane %v275_v57, %v3775_v41 }
 0x16d   : > { %v2097_v20 = vrot.slane %v2069_v11, %v3790_v47  ;;  %v2098_v21 = vcombine.low %v2076_v15, %v2083_v13  ;;  %v855_v38 = vrot.slane %v275_v57, %v3778_v42  ;;  %v859_v22 = vrot.slane %v275_v57, %v3781_v43 }
 0x16e   : > { %v2947_v16 = vcombine.low %v2939_v8, %v2946_v14  ;;  %v863_v23 = vrot.slane %v275_v57, %v3784_v44  ;;  %v867_v39 = vrot.slane %v275_v57, %v3787_v45  ;;  %v2115_v24 = vcombine.low %v839_v10, %v843_v17  ;;  %v4337_v48 = vpop.permute.xlu1 %2958 }
 0x16f   : > { %v2099_v25 = vcombine.low %v2090_v18, %v2097_v20  ;;  %v2106_v26 = vrot.slane %v2098_v21, %v3790_v47  ;;  %v2116_v27 = vcombine.low %v847_v19, %v851_v61  ;;  %v2117_v40 = vcombine.low %v855_v38, %v859_v22 }
 0x170   : > { %3042 = vperm.xlu0 %3443, %v2947_v16   ;;  %v2118_v41 = vcombine.low %v863_v23, %v867_v39  ;;  %v2125_v28 = vrot.slane %v2115_v24, %v3790_v47  ;;  %v3564_v37 = vmov 0.0   ;;  %v4364_v5 = vand.u32 127, %v158_v33 }
 0x171   : > { %v2113_v29 = vrot.slane %v2099_v25, %v3790_v47  ;;  %v2132_v42 = vrot.slane %v2116_v27, %v3790_v47  ;;  %v2139_v43 = vrot.slane %v2117_v40, %v3790_v47  ;;  %162 = vst.msk [vmem:[#allocation2] sm:$0x3] %vm4331_vm0, %v3564_v37 }
 0x172   : > { %v2146_v44 = vrot.slane %v2118_v41, %v3790_v47  ;;  %v4339_v49 = vpop.permute.xlu1 %2961  ;;  %v3050_v6 = vadd.s32 4294967288, %v4364_v5  ;;  %v3057_v7 = vadd.s32 4294967280, %v4364_v5  ;;  %v3048_v10 = vsub.s32 %v4364_v5, %v3763_v36 }
 0x173   : > { %v2114_v30 = vcombine.low %v2106_v26, %v2113_v29  ;;  %v2147_v45 = vcombine.low %v2125_v28, %v2132_v42  ;;  %v3064_v11 = vadd.s32 4294967272, %v4364_v5  ;;  %v3071_v33 = vadd.s32 4294967264, %v4364_v5 }
 0x174   : > { %v2148_v50 = vcombine.low %v2139_v43, %v2146_v44  ;;  %v3053_v15 = vsub.s32 %v3050_v6, %v3763_v36  ;;  %v3060_v13 = vsub.s32 %v3057_v7, %v3763_v36  ;;  %v3078_v14 = vadd.s32 4294967256, %v4364_v5 }
 0x175   : > { %2991 = vperm.xlu1 %3444, %v2114_v30   ;;  %v2155_v31 = vrot.slane %v2147_v45, %v3790_v47  ;;  %v3067_v19 = vsub.s32 %v3064_v11, %v3763_v36  ;;  %v3085_v61 = vadd.s32 4294967248, %v4364_v5  ;;  %v3074_v22 = vsub.s32 %v3071_v33, %v3763_v36 }
 0x176   : > { %v2162_v32 = vrot.slane %v2148_v50, %v3790_v47  ;;  %v4341_v51 = vpop.permute.xlu1 %2964  ;;  %v3054_v38 = vrot.slane %v2953_v60, %v3053_v15  ;;  %v3061_v23 = vrot.slane %v2956_v46, %v3060_v13  ;;  %v3049_v24 = vrot.slane %v2950_v54, %v3048_v10 }
 0x177   : > { %v3081_v25 = vsub.s32 %v3078_v14, %v3763_v36  ;;  %v3068_v40 = vrot.slane %v4337_v48, %v3067_v19  ;;  %v3088_v41 = vsub.s32 %v3085_v61, %v3763_v36  ;;  %v3075_v42 = vrot.slane %v4339_v49, %v3074_v22 }
 0x178   : > { %v2163_v34 = vcombine.low %v2155_v31, %v2162_v32  ;;  %v3056_v29 = vsel %vm3055_vm1, %v3054_v38, %v3049_v24  ;;  %v3092_v44 = vadd.s32 4294967240, %v4364_v5  ;;  %v3106_v49 = vadd.s32 4294967224, %v4364_v5 }
 0x179   : > { %v3063_v43 = vsel %vm3062_vm2, %v3061_v23, %v3056_v29  ;;  %v3082_v50 = vrot.slane %v4341_v51, %v3081_v25  ;;  %v3113_v51 = vadd.s32 4294967216, %v4364_v5 }
 0x17a   : > { %2994 = vperm.xlu1 %3444, %v2163_v34   ;;  %v4343_v52 = vpop.permute.xlu1 %2967  ;;  %v3099_v34 = vadd.s32 4294967232, %v4364_v5  ;;  %v3070_v60 = vsel %vm3069_vm3, %v3068_v40, %v3063_v43  ;;  %v3109_v7 = vsub.s32 %v3106_v49, %v3763_v36 }
 0x17b   : > { %v3001_v55 = vpop.permute.xlu0 %3000  ;;  %v3089_v46 = vrot.slane %v4343_v52, %v3088_v41  ;;  %v3077_v54 = vsel %vm3076_vm4, %v3075_v42, %v3070_v60 }
 0x17c   : > { %v3162_v20 = vrot.slane %v3001_v55, %v3053_v15  ;;  %v3095_v55 = vsub.s32 %v3092_v44, %v3763_v36  ;;  %v3116_v15 = vsub.s32 %v3113_v51, %v3763_v36  ;;  %v227_v51 = vld [vmem:[#allocation2] sm:$0x3] }
 0x180   : > { %v4345_v12 = vpop.permute.xlu1 %2970 }
 0x186   : > { %v3007_v57 = vpop.permute.xlu0 %3006 }
 0x187   : > { %v3172_v28 = vrot.slane %v3007_v57, %v3067_v19  ;;  %v3120_v57 = vadd.s32 4294967208, %v4364_v5 }
 0x18b   : > { %v2998_v56 = vpop.permute.xlu1 %2997 }
 0x18c   : > { %v3158_v17 = vrot.slane %v2998_v56, %v3048_v10  ;;  %v3134_v10 = vadd.s32 4294967192, %v4364_v5 }
 0x18e   : > { %v3163_v39 = vsel %vm3055_vm1, %v3162_v20, %v3158_v17  ;;  %v3096_v17 = vrot.slane %v4345_v12, %v3095_v55  ;;  %v3137_v12 = vsub.s32 %v3134_v10, %v3763_v36 }
 0x190   : > { %v4347_v59 = vpop.permute.xlu0 %3012 }
 0x191   : > { %v3182_v48 = vrot.slane %v4347_v59, %v3081_v25  ;;  %v3102_v59 = vsub.s32 %v3099_v34, %v3763_v36 }
 0x195   : > { %v3004_v58 = vpop.permute.xlu1 %3003 }
 0x196   : > { %v3167_v18 = vrot.slane %v3004_v58, %v3060_v13  ;;  %v3084_v58 = vsel %vm3083_vm5, %v3082_v50, %v3077_v54  ;;  %v3141_v13 = vadd.s32 4294967184, %v4364_v5 }
 0x198   : > { %v3168_v26 = vsel %vm3062_vm2, %v3167_v18, %v3163_v39  ;;  %v3123_v18 = vsub.s32 %v3120_v57, %v3763_v36 }
 0x199   : > { %v3173_v30 = vsel %vm3069_vm3, %v3172_v28, %v3168_v26 }
 0x19b   : > { %v4349_v63 = vpop.permute.xlu0 %3018 }
 0x19c   : > { %v3192_v6 = vrot.slane %v4349_v63, %v3095_v55  ;;  %v3148_v63 = vadd.s32 4294967176, %v4364_v5 }
 0x1a0   : > { %v3010_v62 = vpop.permute.xlu1 %3009 }
 0x1a1   : > { %v3177_v27 = vrot.slane %v3010_v62, %v3074_v22  ;;  %v3127_v62 = vadd.s32 4294967200, %v4364_v5 }
 0x1a3   : > { %v3178_v31 = vsel %vm3076_vm4, %v3177_v27, %v3173_v30  ;;  %v3130_v20 = vsub.s32 %v3127_v62, %v3763_v36 }
 0x1a4   : > { %v3183_v56 = vsel %vm3083_vm5, %v3182_v48, %v3178_v31 }
 0x1a5   : > { %v4351_v0 = vpop.permute.xlu1 %3015 }
 0x1a6   : > { %v3187_v32 = vrot.slane %v4351_v0, %v3088_v41  ;;  %v3091_v0 = vsel %vm3090_vm6, %v3089_v46, %v3084_v58 }
 0x1a8   : > { %v3188_v52 = vsel %vm3090_vm6, %v3187_v32, %v3183_v56 }
 0x1a9   : > { %v3193_v14 = vsel %vm3097_vm7, %v3192_v6, %v3188_v52 }
 0x1aa   : > { %v4353_v1 = vpop.permute.xlu0 %3021 }
 0x1ab   : > { %v3197_v19 = vrot.slane %v4353_v1, %v3102_v59  ;;  %v3144_v1 = vsub.s32 %v3141_v13, %v3763_v36 }
 0x1ad   : > { %v3198_v23 = vsel %vm3104_vm8, %v3197_v19, %v3193_v14 }
 0x1b0   : > { %v4355_v2 = vpop.permute.xlu1 %2973 }
 0x1b1   : > { %v3103_v61 = vrot.slane %v4355_v2, %v3102_v59  ;;  %v3098_v2 = vsel %vm3097_vm7, %v3096_v17, %v3091_v0 }
 0x1b3   : > { %v3105_v26 = vsel %vm3104_vm8, %v3103_v61, %v3098_v2 }
 0x1b5   : > { %v4357_v3 = vpop.permute.xlu0 %3024 }
 0x1b6   : > { %v3202_v38 = vrot.slane %v4357_v3, %v3109_v7 }
 0x1ba   : > { %v4359_v53 = vpop.permute.xlu1 %2976 }
 0x1bb   : > { %v3110_v22 = vrot.slane %v4359_v53, %v3109_v7  ;;  %v3151_v53 = vsub.s32 %v3148_v63, %v3763_v36 }
 0x1bd   : > { %v3112_v41 = vsel %vm3111_vm9, %v3110_v22, %v3105_v26 }
 0x1bf   : > { %v4361_v4 = vpop.permute.xlu0 %3027 }
 0x1c0   : > { %v3207_v39 = vrot.slane %v4361_v4, %v3116_v15 }
 0x1c5   : > { %v4368_v8 = vpop.permute.xlu1 %2979 }
 0x1c6   : > { %v3117_v5 = vrot.slane %v4368_v8, %v3116_v15  ;;  %v3203_v8 = vsel %vm3111_vm9, %v3202_v38, %v3198_v23 }
 0x1c8   : > { %v3119_v29 = vsel %vm3118_vm10, %v3117_v5, %v3112_v41 }
 0x1ca   : > { %v4370_v9 = vpop.permute.xlu0 %3030 }
 0x1cb   : > { %v3212_v24 = vrot.slane %v4370_v9, %v3123_v18 }
 0x1cf   : > { %v4381_v21 = vpop.permute.xlu1 %2982 }
 0x1d0   : > { %v3124_v25 = vrot.slane %v4381_v21, %v3123_v18  ;;  %v3208_v21 = vsel %vm3118_vm10, %v3207_v39, %v3203_v8 }
 0x1d1   : > { %v3213_v43 = vsel %vm3125_vm11, %v3212_v24, %v3208_v21 }
 0x1d4   : > { %v4384_v16 = vpop.permute.xlu0 %3033 }
 0x1d5   : > { %v3217_v27 = vrot.slane %v4384_v16, %v3130_v20  ;;  %v3126_v16 = vsel %vm3125_vm11, %v3124_v25, %v3119_v29 }
 0x1d7   : > { %v3218_v30 = vsel %vm3132_vm12, %v3217_v27, %v3213_v43 }
 0x1da   : > { %v4391_v45 = vpop.permute.xlu1 %2985 }
 0x1db   : > { %v3131_v40 = vrot.slane %v4391_v45, %v3130_v20 }
 0x1dd   : > { %v3133_v45 = vsel %vm3132_vm12, %v3131_v40, %v3126_v16 }
 0x1df   : > { %v4397_v37 = vpop.permute.xlu0 %3036 }
 0x1e0   : > { %v3222_v28 = vrot.slane %v4397_v37, %v3137_v12 }
 0x1e2   : > { %v3223_v31 = vsel %vm3139_vm13, %v3222_v28, %v3218_v30 }
 0x1e4   : > { %v2989_v11 = vpop.permute.xlu1 %2988 }
 0x1e5   : > { %v3138_v9 = vrot.slane %v2989_v11, %v3137_v12 }
 0x1e7   : > { %v3140_v32 = vsel %vm3139_vm13, %v3138_v9, %v3133_v45 }
 0x1e9   : > { %v3040_v33 = vpop.permute.xlu0 %3039 }
 0x1ea   : > { %v3227_v36 = vrot.slane %v3040_v33, %v3144_v1 }
 0x1ec   : > { %v3228_v37 = vsel %vm3146_vm14, %v3227_v36, %v3223_v31 }
 0x1ef   : > { %v3043_v4 = vpop.permute.xlu0 %3042 }
 0x1f0   : > { %v3232_v44 = vrot.slane %v3043_v4, %v3151_v53 }
 0x1f2   : > { %v3233_v46 = vsel %vm3153_vm15, %v3232_v44, %v3228_v37 }
 0x1f4   : > { %v2992_v3 = vpop.permute.xlu1 %2991 }
 0x1f5   : > { %v3145_v42 = vrot.slane %v2992_v3, %v3144_v1 }
 0x1f7   : > { %v3147_v60 = vsel %vm3146_vm14, %v3145_v42, %v3140_v32 }
 0x1f9   : > { %v2995_v50 = vpop.permute.xlu1 %2994 }
 0x1fa   : > { %v3152_v34 = vrot.slane %v2995_v50, %v3151_v53 }
 0x1fc   : > { %v3154_v48 = vsel %vm3153_vm15, %v3152_v34, %v3147_v60 }
 0x1fd   : > { %v3234_v49 = vcombine.low %v3154_v48, %v3233_v46 }
 0x1ff   : > { %v3241_v54 = vrot.slane %v3234_v49, %v3790_v47 }
 0x201   : > { %v3248_v55 = vrot.slane %v3241_v54, %v3790_v47 }
 0x203   : > { %v3250_v56 = vadd.f32 %v3248_v55, %v227_v51 }
 0x205   : > { %3255 = vst.msk [vmem:[#allocation2] sm:$0x3] %vm4331_vm0, %v3250_v56 }
 0x20c   : > { %v3259_v57 = vld [vmem:[#allocation2] sm:$0x3] }
 0x20d   : > { %3260 = vst.msk [vmem:[%s151_s29] sm:$0x3] %vm4331_vm0, %v3259_v57 }
 0x20e   : > { %3488 = shalt.err (!%p3485_p5)
}
 0x20f   : > { %s3489_s22 = scalar_lea.hbm %s4456_s12, 32  ;;  %s3493_s25 = scalar_lea.hbm %s4508_s1, 64 }
 0x210   : > { %p3490_p4 = scmp.ne.s32.totalorder %s4456_s12, %s3489_s22  ;;  %p3494_p12 = scmp.lt.u32.totalorder %s4456_s12, %s4508_s1 }
 0x211   : > { %p3495_p1 = scmp.lt.u32.totalorder %s3493_s25, %s3489_s22  ;;  %p3497_p8 = scmp.lt.u32.totalorder %s3489_s22, %s4456_s12 }
 0x212   : > { %p3491_p7 = pnand %p3490_p4, %p4518_p9 }
 0x213   : > { %p3496_p3 = por %p3495_p1, %p3494_p12 }
 0x214   : > { %p3492_p10 = pneg %p3491_p7 }
 0x215   : > { %p3498_p11 = por %p3497_p8, %p3496_p3 }
 0x217   : > { %p3499_p0 = pnand %p3498_p11, %p3492_p10 }
 0x219   : > { %3502 = shalt.err (!%p3499_p0)
}
 0x21a   : > { %3378 = dma.vmem_to_hbm [thread:$0]  (%p4518_p9), %s4458_s30, 32, %s4456_s12, %s3262_s13  }
 0x21b PF: > { %s3288_s3 = sand.u32 1, %s3537_s6   ;;  %p4519_p6 = scmp.ne.s32.totalorder %s4513_s21, 0 }
 0x21c   : > { %p4520_p13 = scmp.ge.s32.totalorder %s3557_s11, 2  ;;  %s3289_s4 = scalar_lea.sflag [#allocation5], %s3288_s3 }
 0x21e   : > { %p3385_p2 = pnand %p4520_p13, %p4519_p6 }
 0x220   : > { %3532 = dma.done.wait (!%p3385_p2), %s3289_s4, 32  }
 0x221   : > { %3534 = vsyncadd (!%p3385_p2), %s3289_s4, 4294967264  ;;  %s17_s11 = sadd.s32 1, %s3557_s11   ;;  %s4521_s6 = smov %s3541_s7 }
 0x222   : > { %p14_p5 = scmp.ge.s32.totalorder %s17_s11, 4   ;;  %s4522_s7 = smov %s3545_s8 }
 0x223   : > { %s4523_s8 = smov %s3632_s20  ;;  %s4524_s9 = smov %s3553_s10 }
 0x224   : > { %s4525_s10 = smov %s4527_s14  ;;  %16 = sbr.rel (!%p14_p5) target bundleno = 6 (0x6), region = 77 }
 0x22b   :  { %3294 = vsyncpa [#allocation4], 1 }
 0x22c   :  { %3296 = vsyncpa [#allocation4 + $0x1], 1 }
 0x22d   :  { %3297 = vsyncpa [#allocation5], 1 }
 0x22e   :  { %3299 = vsyncpa [#allocation5 + $0x1], 1 }

</bundles_post_ra>
